<compile_context>
chip_gen: v7x
topology: tpu7x:2x2x1
jax: 0.10.0
libtpu: 0.0.40
codegen_flags: <defaults>
</compile_context>

<pallas_src>
import functools

import jax
import jax.numpy as jnp
import numpy as np
from jax.experimental import pallas as pl
from jax.experimental.pallas import tpu as pltpu


def _word_smooth_kernel(tgt_smem, tgt_ref, logp_ref, mask_ref, sim_hbm,
                        out_ref,
                        sim_buf, sem, word_acc, ml_acc, mask_acc, ssq_acc,
                        *, tau_word, margin_sim, block_rows, n_rows):
    i = pl.program_id(0)
    nsteps = pl.num_programs(0)

    @pl.when(i == 0)
    def _init():
        word_acc[...] = jnp.zeros_like(word_acc)
        ml_acc[...] = jnp.zeros_like(ml_acc)
        mask_acc[...] = jnp.zeros_like(mask_acc)
        ssq_acc[...] = jnp.zeros_like(ssq_acc)

    row0 = i * block_rows

    # ---- issue the Sim_Matrix row gather (HBM -> VMEM) for this block ------
    @pl.loop(0, block_rows)
    def _start(r):
        v = tgt_smem[row0 + r]                       # scalar target id (SMEM)
        pltpu.make_async_copy(sim_hbm.at[pl.ds(v, 1), :],
                              sim_buf.at[pl.ds(r, 1), :],
                              sem).start()

    # ---- overlap with the gather: ML loss term + mask sum ------------------
    tgt = tgt_ref[...]                               # (TR, 1) int32
    logp = logp_ref[...].astype(jnp.float32)         # (TR, V) f32 (bf16 ok in HBM)
    mask = mask_ref[...]                             # (TR, 1) f32
    TR, V = logp.shape

    onehot = jax.lax.broadcasted_iota(jnp.int32, (TR, V), 1) == tgt
    logp_tgt = jnp.sum(jnp.where(onehot, logp, 0.0), axis=1, keepdims=True)

    ml_acc[...] += jnp.sum(-logp_tgt * mask, keepdims=True)
    mask_acc[...] += jnp.sum(mask, keepdims=True)

    # ---- wait for all gathered rows ----------------------------------------
    @pl.loop(0, block_rows)
    def _wait(r):
        pltpu.make_async_copy(sim_hbm.at[pl.ds(0, 1), :],
                              sim_buf.at[pl.ds(r, 1), :],
                              sem).wait()

    sim = sim_buf[...]                               # (TR, V) = Sim_Matrix[target]
    if margin_sim:
        sim = sim * (sim >= margin_sim).astype(jnp.float32)

    if tau_word:
        # Row-max shift: mathematically identical after normalization,
        # but safe against overflow for positive similarities / small tau.
        shifted = (sim - jnp.max(sim, axis=1, keepdims=True)) * (1.0 / tau_word)
        exps = jnp.exp(shifted)
    else:
        exps = sim       # matches the torch module when tau_word == 0

    rowsum = jnp.sum(exps, axis=1, keepdims=True)    # (TR, 1)
    inv = pl.reciprocal(rowsum)                      # exact; folded normalization

    # Row-validity so padded rows don't pollute the stats.
    ridx = row0 + jax.lax.broadcasted_iota(jnp.int32, (TR, 1), 0)
    valid = (ridx < n_rows).astype(jnp.float32)

    word_rows = -jnp.sum(logp * exps, axis=1, keepdims=True) * mask * inv
    ssq_rows = jnp.sum(exps * exps, axis=1, keepdims=True) * (inv * inv) * valid

    word_acc[...] += jnp.sum(word_rows, keepdims=True)
    ssq_acc[...] += jnp.sum(ssq_rows, keepdims=True)

    # ---- epilogue: single merged output, written once ----------------------
    @pl.when(i == nsteps - 1)
    def _fin():
        out_ref[:, 0:1] = word_acc[...]
        out_ref[:, 1:2] = ml_acc[...]
        out_ref[:, 2:3] = mask_acc[...]
        out_ref[:, 3:4] = ssq_acc[...]


def word_smooth_forward(logp, target, mask, sim_matrix, *,
                        tau_word, margin_sim=0.0, normalize_batch=True,
                        block_rows=256):
    """Matches WordSmoothCriterion.forward with scores=None,
    limited_vocab_sim=False, penalize_confidence=0."""
    N, T, V = logp.shape
    R = N * T
    assert block_rows % 16 == 0  # f32 (8) and bf16 (16) sublane tiling
    R_pad = ((R + block_rows - 1) // block_rows) * block_rows

    lp = logp.reshape(R, V)                                # keep native dtype
    tgt = target[:, :T].reshape(R).astype(jnp.int32)
    msk = mask[:, :T].reshape(R, 1).astype(jnp.float32)
    if R_pad != R:
        pad = R_pad - R
        lp = jnp.pad(lp, ((0, pad), (0, 0)))
        tgt = jnp.pad(tgt, (0, pad))                       # index 0 is valid
        msk = jnp.pad(msk, ((0, pad), (0, 0)))
    tgt2d = tgt.reshape(R_pad, 1)

    kernel = functools.partial(_word_smooth_kernel,
                               tau_word=float(tau_word),
                               margin_sim=float(margin_sim),
                               block_rows=block_rows,
                               n_rows=R)

    sums = pl.pallas_call(
        kernel,
        out_shape=jax.ShapeDtypeStruct((1, 4), jnp.float32),
        grid_spec=pltpu.PrefetchScalarGridSpec(
            num_scalar_prefetch=1,                         # target ids -> SMEM
            grid=(R_pad // block_rows,),
            in_specs=[
                pl.BlockSpec((block_rows, 1), lambda i, t: (i, 0)),  # target
                pl.BlockSpec((block_rows, V), lambda i, t: (i, 0)),  # logp
                pl.BlockSpec((block_rows, 1), lambda i, t: (i, 0)),  # mask
                pl.BlockSpec(memory_space=pl.ANY),                   # Sim_Matrix (HBM)
            ],
            out_specs=pl.BlockSpec((1, 4), lambda i, t: (0, 0)),
            scratch_shapes=[
                pltpu.VMEM((block_rows, V), jnp.float32),  # gathered sim rows
                pltpu.SemaphoreType.DMA(()),               # gather semaphore
                pltpu.VMEM((1, 1), jnp.float32),           # word accumulator
                pltpu.VMEM((1, 1), jnp.float32),           # ml accumulator
                pltpu.VMEM((1, 1), jnp.float32),           # mask-sum accumulator
                pltpu.VMEM((1, 1), jnp.float32),           # sum(smooth^2) accumulator
            ]),
        compiler_params=pltpu.CompilerParams(
            dimension_semantics=("arbitrary",),            # row-block reduction
            vmem_limit_bytes=64 * 1024 * 1024),
    )(tgt, tgt2d, lp, msk, jnp.asarray(sim_matrix, jnp.float32))

    word_sum = sums[0, 0]
    ml_sum = sums[0, 1]
    mask_sum = sums[0, 2]
    ssq_sum = sums[0, 3]

    n_elem = jnp.float32(R * V)
    word_mean = jnp.asarray(1.0 / V, dtype=jnp.float32)    # normalized rows sum to 1
    word_std = jnp.sqrt(jnp.maximum(ssq_sum / n_elem - word_mean * word_mean, 0.0))

    if normalize_batch:
        denom = jnp.where(mask_sum > 0, mask_sum, 1.0)
        ml_out = ml_sum / denom
        word_out = word_sum / denom
    else:
        ml_out, word_out = ml_sum, word_sum

    stats = {"word_mean": word_mean, "word_std": word_std}
    return ml_out, word_out, stats


def _reference(logp, target, mask, sim_matrix, *, tau_word, normalize_batch=True):
    """Pure-JAX reimplementation of the PyTorch forward (scores=None)."""
    N, T, V = logp.shape
    lp = logp.reshape(-1, V).astype(jnp.float32)
    tgt = target[:, :T].reshape(-1)
    m = mask[:, :T].reshape(-1, 1).astype(jnp.float32)

    logp_tgt = jnp.take_along_axis(lp, tgt[:, None], axis=1)
    ml = jnp.sum(-logp_tgt * m)

    sim = sim_matrix[tgt]
    smooth = jnp.exp(sim / tau_word)
    smooth = smooth / jnp.sum(smooth, axis=1, keepdims=True)
    word = jnp.sum(-lp * m * smooth)

    if normalize_batch:
        ml = ml / jnp.sum(m)
        word = word / jnp.sum(m)
    return ml, word, jnp.mean(smooth), jnp.std(smooth)


if __name__ == "__main__":
    # Module-consistent small shapes: batch N=4, seq T=60, vocab V=256.
    N, T, V, E = 4, 60, 256, 32
    tau_word = 0.3
    use_cooc = False

    key = jax.random.PRNGKey(0)
    k_emb, k_logits, k_tgt = jax.random.split(key, 3)

    # Deterministic synthetic similarity matrix (__init__ semantics):
    # cosine similarities, then M = M - 1 since use_cooc is False.
    emb = jax.random.normal(k_emb, (V, E), dtype=jnp.float32)
    emb = emb / jnp.linalg.norm(emb, axis=1, keepdims=True)
    sim_matrix = emb @ emb.T
    if not use_cooc:
        sim_matrix = sim_matrix - 1.0
    sim_matrix = sim_matrix.astype(jnp.float32)

    logp = jax.nn.log_softmax(
        jax.random.normal(k_logits, (N, T, V), dtype=jnp.float32), axis=-1)
    target = jax.random.randint(k_tgt, (N, T), 0, V, dtype=jnp.int32)
    mask = jnp.ones((N, T), dtype=jnp.float32)
    mask = mask.at[1, 40:].set(0.0).at[3, 10:].set(0.0)

    # ---- f32 logp, block_rows=128 -> 2 row blocks + 16 padded rows ----------
    ml_out, word_out, stats = word_smooth_forward(
        logp, target, mask, sim_matrix,
        tau_word=tau_word, normalize_batch=True, block_rows=128)
    jax.block_until_ready((ml_out, word_out, stats))

    ml_ref, word_ref, mean_ref, std_ref = _reference(
        logp, target, mask, sim_matrix,
        tau_word=tau_word, normalize_batch=True)

    assert np.allclose(np.asarray(ml_out), np.asarray(ml_ref), rtol=1e-4, atol=1e-5)
    assert np.allclose(np.asarray(word_out), np.asarray(word_ref), rtol=1e-4, atol=1e-5)
    assert np.allclose(np.asarray(stats["word_mean"]), np.asarray(mean_ref),
                       rtol=1e-4, atol=1e-6)
    assert np.allclose(np.asarray(stats["word_std"]), np.asarray(std_ref),
                       rtol=1e-3, atol=1e-5)

    # ---- bf16 logp streamed straight from HBM, default block_rows=256 -------
    logp_bf16 = logp.astype(jnp.bfloat16)
    ml_b, word_b, stats_b = word_smooth_forward(
        logp_bf16, target, mask, sim_matrix,
        tau_word=tau_word, normalize_batch=True, block_rows=256)
    jax.block_until_ready((ml_b, word_b, stats_b))

    ml_rb, word_rb, _, std_rb = _reference(
        logp_bf16.astype(jnp.float32), target, mask, sim_matrix,
        tau_word=tau_word, normalize_batch=True)
    assert np.allclose(np.asarray(ml_b), np.asarray(ml_rb), rtol=1e-4, atol=1e-5)
    assert np.allclose(np.asarray(word_b), np.asarray(word_rb), rtol=1e-4, atol=1e-5)
    assert np.allclose(np.asarray(stats_b["word_std"]), np.asarray(std_rb),
                       rtol=1e-3, atol=1e-5)

    print("KERNEL_OK")
</pallas_src>

<mosaic_0001>
module attributes {stable_mosaic.version = 11 : i64} {
  func.func @_word_smooth_kernel(%arg0: i32, %arg1: memref<256xi32, #tpu.memory_space<smem>>, %arg2: memref<128x1xi32, #tpu.memory_space<vmem>>, %arg3: memref<128x256xf32, #tpu.memory_space<vmem>>, %arg4: memref<128x1xf32, #tpu.memory_space<vmem>>, %arg5: memref<256x256xf32, #tpu.memory_space<any>>, %arg6: memref<1x4xf32, #tpu.memory_space<vmem>>, %arg7: memref<128x256xf32, #tpu.memory_space<vmem>>, %arg8: memref<!tpu.dma_semaphore, #tpu.memory_space<semaphore_mem>>, %arg9: memref<1x1xf32, #tpu.memory_space<vmem>>, %arg10: memref<1x1xf32, #tpu.memory_space<vmem>>, %arg11: memref<1x1xf32, #tpu.memory_space<vmem>>, %arg12: memref<1x1xf32, #tpu.memory_space<vmem>>) attributes {dimension_semantics = [#tpu.dimension_semantics<arbitrary>], iteration_bounds = array<i64: 2>, scalar_prefetch = 1 : i64, scratch_operands = 6 : i64, tpu.core_type = #tpu.core_type<tc>, window_params = [{transform_indices = @transform_0, window_bounds = array<i64: 128, 1>}, {transform_indices = @transform_1, window_bounds = array<i64: 128, 256>}, {transform_indices = @transform_2, window_bounds = array<i64: 128, 1>}, {}, {pipeline_mode = #tpu.pipeline_mode<synchronous>, transform_indices = @transform_4, window_bounds = array<i64: 1, 4>}]} {
    %c0_i32 = arith.constant 0 : i32
    %0 = arith.cmpi eq, %arg0, %c0_i32 : i32
    %1 = arith.extui %0 : i1 to i32
    %c0_i32_0 = arith.constant 0 : i32
    %2 = arith.cmpi ne, %1, %c0_i32_0 : i32
    scf.if %2 {
      %cst_45 = arith.constant 0.000000e+00 : f32
      %85 = vector.broadcast %cst_45 : f32 to vector<1x1xf32>
      %c0_46 = arith.constant 0 : index
      %c0_47 = arith.constant 0 : index
      %86 = vector.load %arg9[%c0_46, %c0_47] : memref<1x1xf32, #tpu.memory_space<vmem>>, vector<1x1xf32>
      tpu.vector_store %arg9[%c0_46, %c0_47], %85 {strides = array<i32>} : memref<1x1xf32, #tpu.memory_space<vmem>>, vector<1x1xf32>,
      %cst_48 = arith.constant 0.000000e+00 : f32
      %87 = vector.broadcast %cst_48 : f32 to vector<1x1xf32>
      %c0_49 = arith.constant 0 : index
      %c0_50 = arith.constant 0 : index
      %88 = vector.load %arg10[%c0_49, %c0_50] : memref<1x1xf32, #tpu.memory_space<vmem>>, vector<1x1xf32>
      tpu.vector_store %arg10[%c0_49, %c0_50], %87 {strides = array<i32>} : memref<1x1xf32, #tpu.memory_space<vmem>>, vector<1x1xf32>,
      %cst_51 = arith.constant 0.000000e+00 : f32
      %89 = vector.broadcast %cst_51 : f32 to vector<1x1xf32>
      %c0_52 = arith.constant 0 : index
      %c0_53 = arith.constant 0 : index
      %90 = vector.load %arg11[%c0_52, %c0_53] : memref<1x1xf32, #tpu.memory_space<vmem>>, vector<1x1xf32>
      tpu.vector_store %arg11[%c0_52, %c0_53], %89 {strides = array<i32>} : memref<1x1xf32, #tpu.memory_space<vmem>>, vector<1x1xf32>,
      %cst_54 = arith.constant 0.000000e+00 : f32
      %91 = vector.broadcast %cst_54 : f32 to vector<1x1xf32>
      %c0_55 = arith.constant 0 : index
      %c0_56 = arith.constant 0 : index
      %92 = vector.load %arg12[%c0_55, %c0_56] : memref<1x1xf32, #tpu.memory_space<vmem>>, vector<1x1xf32>
      tpu.vector_store %arg12[%c0_55, %c0_56], %91 {strides = array<i32>} : memref<1x1xf32, #tpu.memory_space<vmem>>, vector<1x1xf32>,
    } else {
    }
    %c128_i32 = arith.constant 128 : i32
    %3 = arith.muli %arg0, %c128_i32 : i32
    %c0_i32_1 = arith.constant 0 : i32
    %c128_i32_2 = arith.constant 128 : i32
    %4 = arith.addi %c0_i32_1, %c128_i32_2 : i32
    %c1_i32 = arith.constant 1 : i32
    scf.for %arg13 = %c0_i32_1 to %4 step %c1_i32  : i32 {
      %c1_i32_45 = arith.constant 1 : i32
      %85 = arith.muli %arg13, %c1_i32_45 : i32
      %c0_i32_46 = arith.constant 0 : i32
      %86 = arith.addi %c0_i32_46, %85 : i32
      %87 = arith.addi %3, %86 : i32
      %88 = arith.index_cast %87 : i32 to index
      %89 = memref.load %arg1[%88] : memref<256xi32, #tpu.memory_space<smem>>
      %c0_i32_47 = arith.constant 0 : i32
      %90 = tpu.memref_slice %arg5[%89, %c0_i32_47] : memref<256x256xf32, #tpu.memory_space<any>> -> memref<1x256xf32, #tpu.memory_space<any>>
      %c0_i32_48 = arith.constant 0 : i32
      %91 = tpu.memref_slice %arg7[%86, %c0_i32_48] : memref<128x256xf32, #tpu.memory_space<vmem>> -> memref<1x256xf32, #tpu.memory_space<vmem>>
      tpu.enqueue_dma source(%90 : memref<1x256xf32, #tpu.memory_space<any>>) target(%91 : memref<1x256xf32, #tpu.memory_space<vmem>>) target_semaphore(%arg8 : memref<!tpu.dma_semaphore, #tpu.memory_space<semaphore_mem>>)
    }
    %c128_i32_3 = arith.constant 128 : i32
    %c0 = arith.constant 0 : index
    %c0_4 = arith.constant 0 : index
    %5 = vector.load %arg2[%c0, %c0_4] : memref<128x1xi32, #tpu.memory_space<vmem>>, vector<128x1xi32>
    %c0_5 = arith.constant 0 : index
    %c0_6 = arith.constant 0 : index
    %6 = vector.load %arg3[%c0_5, %c0_6] : memref<128x256xf32, #tpu.memory_space<vmem>>, vector<128x256xf32>
    %c0_7 = arith.constant 0 : index
    %c0_8 = arith.constant 0 : index
    %7 = vector.load %arg4[%c0_7, %c0_8] : memref<128x1xf32, #tpu.memory_space<vmem>>, vector<128x1xf32>
    %8 = tpu.iota {dimensions = array<i32: 1>} : vector<128x256xi32>
    %9 = vector.broadcast %5 : vector<128x1xi32> to vector<128x256xi32>
    %10 = arith.cmpi eq, %8, %9 : vector<128x256xi32>
    %cst = arith.constant 0.000000e+00 : f32
    %11 = vector.broadcast %cst : f32 to vector<128x256xf32>
    %12 = arith.select %10, %6, %11 : vector<128x256xi1>, vector<128x256xf32>
    %cst_9 = arith.constant dense<0.000000e+00> : vector<128xf32>
    %13 = vector.multi_reduction <add>, %12, %cst_9 [1] : vector<128x256xf32> to vector<128xf32>
    %14 = vector.shape_cast %13 : vector<128xf32> to vector<128x1xf32>
    %c0_10 = arith.constant 0 : index
    %c0_11 = arith.constant 0 : index
    %15 = vector.load %arg10[%c0_10, %c0_11] : memref<1x1xf32, #tpu.memory_space<vmem>>, vector<1x1xf32>
    %cst_12 = arith.constant 0.000000e+00 : f32
    %16 = vector.broadcast %cst_12 : f32 to vector<128x1xf32>
    %17 = arith.subf %16, %14 : vector<128x1xf32>
    %18 = arith.mulf %17, %7 : vector<128x1xf32>
    %19 = vector.shape_cast %18 : vector<128x1xf32> to vector<1x128x1xf32>
    %cst_13 = arith.constant dense<0.000000e+00> : vector<1xf32>
    %20 = vector.multi_reduction <add>, %19, %cst_13 [1, 2] : vector<1x128x1xf32> to vector<1xf32>
    %21 = vector.shape_cast %20 : vector<1xf32> to vector<1x1x1xf32>
    %22 = vector.extract %21[0, 0, 0] : f32 from vector<1x1x1xf32>
    %23 = vector.broadcast %22 : f32 to vector<1x1xf32>
    %24 = arith.addf %15, %23 : vector<1x1xf32>
    %c0_14 = arith.constant 0 : index
    %c0_15 = arith.constant 0 : index
    %25 = vector.load %arg10[%c0_14, %c0_15] : memref<1x1xf32, #tpu.memory_space<vmem>>, vector<1x1xf32>
    tpu.vector_store %arg10[%c0_14, %c0_15], %24 {strides = array<i32>} : memref<1x1xf32, #tpu.memory_space<vmem>>, vector<1x1xf32>,
    %c0_16 = arith.constant 0 : index
    %c0_17 = arith.constant 0 : index
    %26 = vector.load %arg11[%c0_16, %c0_17] : memref<1x1xf32, #tpu.memory_space<vmem>>, vector<1x1xf32>
    %27 = vector.shape_cast %7 : vector<128x1xf32> to vector<1x128x1xf32>
    %cst_18 = arith.constant dense<0.000000e+00> : vector<1xf32>
    %28 = vector.multi_reduction <add>, %27, %cst_18 [1, 2] : vector<1x128x1xf32> to vector<1xf32>
    %29 = vector.shape_cast %28 : vector<1xf32> to vector<1x1x1xf32>
    %30 = vector.extract %29[0, 0, 0] : f32 from vector<1x1x1xf32>
    %31 = vector.broadcast %30 : f32 to vector<1x1xf32>
    %32 = arith.addf %26, %31 : vector<1x1xf32>
    %c0_19 = arith.constant 0 : index
    %c0_20 = arith.constant 0 : index
    %33 = vector.load %arg11[%c0_19, %c0_20] : memref<1x1xf32, #tpu.memory_space<vmem>>, vector<1x1xf32>
    tpu.vector_store %arg11[%c0_19, %c0_20], %32 {strides = array<i32>} : memref<1x1xf32, #tpu.memory_space<vmem>>, vector<1x1xf32>,
    %c0_i32_21 = arith.constant 0 : i32
    %c128_i32_22 = arith.constant 128 : i32
    %34 = arith.addi %c0_i32_21, %c128_i32_22 : i32
    %c1_i32_23 = arith.constant 1 : i32
    scf.for %arg13 = %c0_i32_21 to %34 step %c1_i32_23  : i32 {
      %c1_i32_45 = arith.constant 1 : i32
      %85 = arith.muli %arg13, %c1_i32_45 : i32
      %c0_i32_46 = arith.constant 0 : i32
      %86 = arith.addi %c0_i32_46, %85 : i32
      %c0_i32_47 = arith.constant 0 : i32
      %c0_i32_48 = arith.constant 0 : i32
      %87 = tpu.memref_slice %arg5[%c0_i32_47, %c0_i32_48] : memref<256x256xf32, #tpu.memory_space<any>> -> memref<1x256xf32, #tpu.memory_space<any>>
      %c0_i32_49 = arith.constant 0 : i32
      %88 = tpu.memref_slice %arg7[%86, %c0_i32_49] : memref<128x256xf32, #tpu.memory_space<vmem>> -> memref<1x256xf32, #tpu.memory_space<vmem>>
      tpu.wait_dma2 semaphore(%arg8 : memref<!tpu.dma_semaphore, #tpu.memory_space<semaphore_mem>>) src(%87 : memref<1x256xf32, #tpu.memory_space<any>>) dst(%88 : memref<1x256xf32, #tpu.memory_space<vmem>>)
    }
    %c128_i32_24 = arith.constant 128 : i32
    %c0_25 = arith.constant 0 : index
    %c0_26 = arith.constant 0 : index
    %35 = vector.load %arg7[%c0_25, %c0_26] : memref<128x256xf32, #tpu.memory_space<vmem>>, vector<128x256xf32>
    %cst_27 = arith.constant dense<0xFF800000> : vector<128xf32>
    %36 = vector.multi_reduction <maximumf>, %35, %cst_27 [1] : vector<128x256xf32> to vector<128xf32>
    %37 = vector.shape_cast %36 : vector<128xf32> to vector<128x1xf32>
    %38 = vector.broadcast %37 : vector<128x1xf32> to vector<128x256xf32>
    %39 = arith.subf %35, %38 : vector<128x256xf32>
    %cst_28 = arith.constant 3.33333325 : f32
    %40 = vector.broadcast %cst_28 : f32 to vector<128x256xf32>
    %41 = arith.mulf %39, %40 : vector<128x256xf32>
    %42 = math.exp %41 : vector<128x256xf32>
    %cst_29 = arith.constant dense<0.000000e+00> : vector<128xf32>
    %43 = vector.multi_reduction <add>, %42, %cst_29 [1] : vector<128x256xf32> to vector<128xf32>
    %44 = vector.shape_cast %43 : vector<128xf32> to vector<128x1xf32>
    %45 = tpu.reciprocal %44 : vector<128x1xf32> -> vector<128x1xf32>
    %46 = tpu.iota {dimensions = array<i32: 0>} : vector<128x1xi32>
    %47 = vector.broadcast %3 : i32 to vector<128x1xi32>
    %48 = arith.addi %47, %46 : vector<128x1xi32>
    %c240_i32 = arith.constant 240 : i32
    %49 = vector.broadcast %c240_i32 : i32 to vector<128x1xi32>
    %50 = arith.cmpi slt, %48, %49 : vector<128x1xi32>
    %51 = arith.extui %50 : vector<128x1xi1> to vector<128x1xi32>
    %52 = arith.sitofp %51 : vector<128x1xi32> to vector<128x1xf32>
    %53 = arith.mulf %6, %42 : vector<128x256xf32>
    %cst_30 = arith.constant dense<0.000000e+00> : vector<128xf32>
    %54 = vector.multi_reduction <add>, %53, %cst_30 [1] : vector<128x256xf32> to vector<128xf32>
    %55 = vector.shape_cast %54 : vector<128xf32> to vector<128x1xf32>
    %cst_31 = arith.constant 0.000000e+00 : f32
    %56 = vector.broadcast %cst_31 : f32 to vector<128x1xf32>
    %57 = arith.subf %56, %55 : vector<128x1xf32>
    %58 = arith.mulf %57, %7 : vector<128x1xf32>
    %59 = arith.mulf %58, %45 : vector<128x1xf32>
    %60 = arith.mulf %42, %42 : vector<128x256xf32>
    %cst_32 = arith.constant dense<0.000000e+00> : vector<128xf32>
    %61 = vector.multi_reduction <add>, %60, %cst_32 [1] : vector<128x256xf32> to vector<128xf32>
    %62 = vector.shape_cast %61 : vector<128xf32> to vector<128x1xf32>
    %63 = arith.mulf %45, %45 : vector<128x1xf32>
    %64 = arith.mulf %62, %63 : vector<128x1xf32>
    %65 = arith.mulf %64, %52 : vector<128x1xf32>
    %c0_33 = arith.constant 0 : index
    %c0_34 = arith.constant 0 : index
    %66 = vector.load %arg9[%c0_33, %c0_34] : memref<1x1xf32, #tpu.memory_space<vmem>>, vector<1x1xf32>
    %67 = vector.shape_cast %59 : vector<128x1xf32> to vector<1x128x1xf32>
    %cst_35 = arith.constant dense<0.000000e+00> : vector<1xf32>
    %68 = vector.multi_reduction <add>, %67, %cst_35 [1, 2] : vector<1x128x1xf32> to vector<1xf32>
    %69 = vector.shape_cast %68 : vector<1xf32> to vector<1x1x1xf32>
    %70 = vector.extract %69[0, 0, 0] : f32 from vector<1x1x1xf32>
    %71 = vector.broadcast %70 : f32 to vector<1x1xf32>
    %72 = arith.addf %66, %71 : vector<1x1xf32>
    %c0_36 = arith.constant 0 : index
    %c0_37 = arith.constant 0 : index
    %73 = vector.load %arg9[%c0_36, %c0_37] : memref<1x1xf32, #tpu.memory_space<vmem>>, vector<1x1xf32>
    tpu.vector_store %arg9[%c0_36, %c0_37], %72 {strides = array<i32>} : memref<1x1xf32, #tpu.memory_space<vmem>>, vector<1x1xf32>,
    %c0_38 = arith.constant 0 : index
    %c0_39 = arith.constant 0 : index
    %74 = vector.load %arg12[%c0_38, %c0_39] : memref<1x1xf32, #tpu.memory_space<vmem>>, vector<1x1xf32>
    %75 = vector.shape_cast %65 : vector<128x1xf32> to vector<1x128x1xf32>
    %cst_40 = arith.constant dense<0.000000e+00> : vector<1xf32>
    %76 = vector.multi_reduction <add>, %75, %cst_40 [1, 2] : vector<1x128x1xf32> to vector<1xf32>
    %77 = vector.shape_cast %76 : vector<1xf32> to vector<1x1x1xf32>
    %78 = vector.extract %77[0, 0, 0] : f32 from vector<1x1x1xf32>
    %79 = vector.broadcast %78 : f32 to vector<1x1xf32>
    %80 = arith.addf %74, %79 : vector<1x1xf32>
    %c0_41 = arith.constant 0 : index
    %c0_42 = arith.constant 0 : index
    %81 = vector.load %arg12[%c0_41, %c0_42] : memref<1x1xf32, #tpu.memory_space<vmem>>, vector<1x1xf32>
    tpu.vector_store %arg12[%c0_41, %c0_42], %80 {strides = array<i32>} : memref<1x1xf32, #tpu.memory_space<vmem>>, vector<1x1xf32>,
    %c1_i32_43 = arith.constant 1 : i32
    %82 = arith.cmpi eq, %arg0, %c1_i32_43 : i32
    %83 = arith.extui %82 : i1 to i32
    %c0_i32_44 = arith.constant 0 : i32
    %84 = arith.cmpi ne, %83, %c0_i32_44 : i32
    scf.if %84 {
      %c0_45 = arith.constant 0 : index
      %c0_46 = arith.constant 0 : index
      %85 = vector.load %arg9[%c0_45, %c0_46] : memref<1x1xf32, #tpu.memory_space<vmem>>, vector<1x1xf32>
      %c0_47 = arith.constant 0 : index
      %c0_48 = arith.constant 0 : index
      %86 = vector.load %arg6[%c0_47, %c0_48] : memref<1x4xf32, #tpu.memory_space<vmem>>, vector<1x1xf32>
      tpu.vector_store %arg6[%c0_47, %c0_48], %85 {strides = array<i32>} : memref<1x4xf32, #tpu.memory_space<vmem>>, vector<1x1xf32>,
      %c0_49 = arith.constant 0 : index
      %c0_50 = arith.constant 0 : index
      %87 = vector.load %arg10[%c0_49, %c0_50] : memref<1x1xf32, #tpu.memory_space<vmem>>, vector<1x1xf32>
      %c0_51 = arith.constant 0 : index
      %c1 = arith.constant 1 : index
      %88 = vector.load %arg6[%c0_51, %c1] : memref<1x4xf32, #tpu.memory_space<vmem>>, vector<1x1xf32>
      tpu.vector_store %arg6[%c0_51, %c1], %87 {strides = array<i32>} : memref<1x4xf32, #tpu.memory_space<vmem>>, vector<1x1xf32>,
      %c0_52 = arith.constant 0 : index
      %c0_53 = arith.constant 0 : index
      %89 = vector.load %arg11[%c0_52, %c0_53] : memref<1x1xf32, #tpu.memory_space<vmem>>, vector<1x1xf32>
      %c0_54 = arith.constant 0 : index
      %c2 = arith.constant 2 : index
      %90 = vector.load %arg6[%c0_54, %c2] : memref<1x4xf32, #tpu.memory_space<vmem>>, vector<1x1xf32>
      tpu.vector_store %arg6[%c0_54, %c2], %89 {strides = array<i32>} : memref<1x4xf32, #tpu.memory_space<vmem>>, vector<1x1xf32>,
      %c0_55 = arith.constant 0 : index
      %c0_56 = arith.constant 0 : index
      %91 = vector.load %arg12[%c0_55, %c0_56] : memref<1x1xf32, #tpu.memory_space<vmem>>, vector<1x1xf32>
      %c0_57 = arith.constant 0 : index
      %c3 = arith.constant 3 : index
      %92 = vector.load %arg6[%c0_57, %c3] : memref<1x4xf32, #tpu.memory_space<vmem>>, vector<1x1xf32>
      tpu.vector_store %arg6[%c0_57, %c3], %91 {strides = array<i32>} : memref<1x4xf32, #tpu.memory_space<vmem>>, vector<1x1xf32>,
    } else {
    }
    return
  }
  func.func @transform_0(%arg0: i32, %arg1: memref<256xi32, #tpu.memory_space<smem>>) -> (i32, i32) {
    %c0_i32 = arith.constant 0 : i32
    %c0_i32_0 = arith.constant 0 : i32
    return %arg0, %c0_i32 : i32, i32
  }
  func.func @transform_1(%arg0: i32, %arg1: memref<256xi32, #tpu.memory_space<smem>>) -> (i32, i32) {
    %c0_i32 = arith.constant 0 : i32
    %c0_i32_0 = arith.constant 0 : i32
    return %arg0, %c0_i32 : i32, i32
  }
  func.func @transform_2(%arg0: i32, %arg1: memref<256xi32, #tpu.memory_space<smem>>) -> (i32, i32) {
    %c0_i32 = arith.constant 0 : i32
    %c0_i32_0 = arith.constant 0 : i32
    return %arg0, %c0_i32 : i32, i32
  }
  func.func @transform_4(%arg0: i32, %arg1: memref<256xi32, #tpu.memory_space<smem>>) -> (i32, i32) {
    %c0_i32 = arith.constant 0 : i32
    %c0_i32_0 = arith.constant 0 : i32
    %c0_i32_1 = arith.constant 0 : i32
    return %c0_i32, %c0_i32_0 : i32, i32
  }
}

</mosaic_0001>

<bundles_post_ra>
// kernel: tpu_custom_call.1
= control target key start
LH: loop header
LB: loop body
LE: loop exit
PB: predicated region body
PF: predicated region fallthrough
CT: control target
= control target key end

     0   :  { %s3253_s0 = inlined_call_operand.hbm [shape: s32[256], index: 0, kind: input, shape index: {}]   ;;  %s3254_s1 = inlined_call_operand.hbm [shape: s32[256,1], index: 1, kind: input, shape index: {}]   ;;  %s3255_s2 = inlined_call_operand.hbm [shape: f32[256,256], index: 2, kind: input, shape index: {}]   ;;  %s3256_s3 = inlined_call_operand.hbm [shape: f32[256,1], index: 3, kind: input, shape index: {}]   ;;  %s3257_s4 = inlined_call_operand.hbm [shape: f32[256,256], index: 4, kind: input, shape index: {}]   ;;  %s3258_s5 = inlined_call_operand.hbm [shape: f32[1,4], index: 5, kind: output, shape index: {}]  }
   0x1   :  { %3294 = sst [smem:[#allocation56_spill]] %s3254_s1  ;;  %s1758_s20 = scalar_lea.hbm %s3253_s0, 32 }
   0x2   :  { %p1759_p0 = scmp.ne.s32.totalorder %s3253_s0, %s1758_s20  ;;  %p1762_p1 = scmp.lt.u32.totalorder %s1758_s20, %s3253_s0 }
   0x4   :  { %p1764_p2 = pnand %p1762_p1, %p1759_p0 }
   0x6   :  { %1767 = shalt.err (!%p1764_p2)  }
   0x7   :  { %s1972_s25 = smov [#allocation9]  }
   0x8   :  { %11 = dma.hbm_to_smem %s3253_s0, 32, %s1972_s25, [#allocation8] }
   0x9   :  { %1932 = dma.done.wait [#allocation8], 32 }
   0xa   :  { %1933 = vsyncadd [#allocation8], 4294967264 }
   0xb   :  { %13 = sfence }
   0xc   :  { %14 = vsyncpa [#allocation11], 0 }
   0xd   :  { %16 = vsyncpa [#allocation11 + $0x1], 0 }
   0xe   :  { %17 = vsyncpa [#allocation14], 0 }
   0xf   :  { %19 = vsyncpa [#allocation14 + $0x1], 0 }
  0x10   :  { %20 = vsyncpa [#allocation12], 0  ;;  %s2032_s28 = smov 0   ;;  %s2034_s29 = smov 0  }
  0x11   :  { %s2036_s30 = smov 0   ;;  %s2038_s6 = smov 0  }
  0x12 LB: > { %s2051_s0 = sadd.s32 4294967295, %s1962_s6   ;;  %s2054_s7 = sadd.s32 1, %s1962_s6   ;;  %s1962_s6 = sphi %s2038_s6, %s3374_s6   ;;  %s1958_s30 = sphi %s2036_s30, %s3373_s30   ;;  %s1954_s29 = sphi %s2034_s29, %s3372_s29   ;;  %s1950_s28 = sphi %s2032_s28, %s3371_s28  }
  0x13   : > { %s30_s8 = ssub.s32 %s1962_s6, %s2054_s7  ;;  %s33_s9 = sadd.s32 1, %s1958_s30 }
  0x14   : > { %p31_p3 = scmp.eq.s32.totalorder %s30_s8, 0  ;;  %p40_p4 = scmp.ne.s32.totalorder %s1958_s30, %s1954_s29 }
  0x15   : > { %p41_p5 = scmp.eq.s32.totalorder %s1962_s6, 0  ;;  %p46_p6 = scmp.ne.s32.totalorder %s1954_s29, %s1950_s28 }
  0x16   : > { %s2064_s10 = scalar_select %p31_p3, %s1958_s30, %s33_s9  }
  0x17   : > { %p42_p7 = por %p41_p5, %p40_p4  ;;  %p47_p8 = scmp.eq.s32.totalorder %s2051_s0, 0 }
  0x18   : > { %p1595_p9 = scmp.lt.s32.totalorder %s1962_s6, 2  ;;  %s2073_s12 = sand.u32 1, %s1958_s30  }
  0x19   : > { %p2068_p10 = por %p47_p8, %p46_p6  ;;  %s164_s14 = sand.u32 1, %s1962_s6  }
  0x1a   : > { %p2075_p11 = pnand %p1595_p9, %p42_p7  ;;  %s1522_s15 = sshll.u32 %s2073_s12, 8 }
  0x1b   : > { %s3295_s11 = scalar_select %p2068_p10, 1, 0 }
  0x1c   : > { %s1565_s16 = sshll.u32 %s1962_s6, 12  ;;  %s168_s17 = scalar_lea.vmem [#allocation13], %s1522_s15 }
  0x1d   : > { %s176_s18 = sshll.u32 %s168_s17, 4  ;;  %s2085_s21 = scalar_lea.hbm %s3255_s2, %s1565_s16  ;;  %s2087_s18 = int_to_ptr.vmem [resolvable:$true] %s176_s18 }
  0x1e   : > { %s2089_s22 = scalar_lea.sflag [#allocation14], %s164_s14  ;;  %s1768_s23 = scalar_lea.hbm %s2085_s21, 4096 }
  0x1f   : > { %p1769_p12 = scmp.ne.s32.totalorder %s2085_s21, %s1768_s23  ;;  %p2095_p13 = pneg %p2075_p11 }
  0x20   : > { %s1773_s27 = scalar_lea.hbm %s3255_s2, 8192  ;;  %p1774_p2 = scmp.lt.u32.totalorder %s2085_s21, %s3255_s2 }
  0x21   : > { %p1771_p0 = pnand %p2095_p13, %p1769_p12  ;;  %p1775_p3 = scmp.lt.u32.totalorder %s1773_s27, %s1768_s23 }
  0x22   : > { %p1777_p5 = scmp.lt.u32.totalorder %s1768_s23, %s2085_s21 }
  0x23   : > { %p1772_p1 = pneg %p1771_p0  ;;  %p1776_p4 = por %p1775_p3, %p1774_p2 }
  0x25   : > { %p1778_p6 = por %p1777_p5, %p1776_p4 }
  0x27   : > { %p1779_p7 = pnand %p1778_p6, %p1772_p1 }
  0x29   : > { %1782 = shalt.err (!%p1779_p7)
}
  0x2a   : > { %s1783_s9 = scalar_lea.vmem %s2087_s18, 4096  ;;  %s1973_s14 = smov [#allocation13]  }
  0x2b   : > { %p1784_p8 = scmp.ne.s32.totalorder %s2087_s18, %s1783_s9  ;;  %s1788_s15 = sshll.u32 %s1973_s14, 4  ;;  %s1789_s15 = int_to_ptr.vmem [resolvable:$false] %s1788_s15 }
  0x2c   : > { %s1790_s16 = scalar_lea.vmem %s1789_s15, 8192  ;;  %p1791_p0 = scmp.lt.s32.totalorder %s2087_s18, %s1789_s15 }
  0x2d   : > { %p1786_p9 = pnand %p1784_p8, %p2095_p13  ;;  %p1792_p10 = scmp.lt.s32.totalorder %s1790_s16, %s1783_s9 }
  0x2f   : > { %p1787_p12 = pneg %p1786_p9  ;;  %p1793_p2 = por %p1792_p10, %p1791_p0 }
  0x31   : > { %p1794_p3 = pnand %p1793_p2, %p1787_p12 }
  0x33   : > { %1797 = shalt.err (!%p1794_p3)
}
  0x34   : > { %s1974_s17 = smov 256   ;;  %s1975_s19 = smov 16  }
  0x35   : > { %1591 = dma.hbm_to_vmem [thread:$0]  (!%p2075_p11), %s2085_s21, 4096, %s2087_s18, %s2089_s22, %s1974_s17, %s1974_s17, %s1975_s19  }
  0x36   : > { %p1529_p1 = scmp.ge.s32.totalorder %s1962_s6, 1  ;;  %p205_p10 = scmp.lt.s32.totalorder %s1962_s6, 3 }
  0x37   : > { %s1519_s20 = sshll.u32 %s2073_s12, 7  ;;  %s1563_s25 = sshll.u32 %s1962_s6, 11 }
  0x38   : > { %p2122_p4 = pnand %p1529_p1, %p205_p10  ;;  %s147_s26 = scalar_lea.vmem [#allocation10], %s1519_s20 }
  0x39   : > { %s154_s27 = sshll.u32 %s147_s26, 4  ;;  %s3299_s1 = sld [smem:[#allocation56_spill]]  ;;  %s2136_s27 = int_to_ptr.vmem [resolvable:$true] %s154_s27 }
  0x3a   : > { %s3298_s23 = scalar_select %p2122_p4, 1, 0 }
  0x3b   : > { %s144_s18 = scalar_lea.sflag [#allocation11], %s2073_s12 }
  0x3f   : > { %s2134_s9 = scalar_lea.hbm %s3299_s1, %s1563_s25  ;;  %s1803_s16 = scalar_lea.hbm %s3299_s1, 4096 }
  0x40   : > { %s1798_s21 = scalar_lea.hbm %s2134_s9, 2048  ;;  %p1804_p8 = scmp.lt.u32.totalorder %s2134_s9, %s3299_s1 }
  0x41   : > { %p1799_p5 = scmp.ne.s32.totalorder %s2134_s9, %s1798_s21  ;;  %p1805_p9 = scmp.lt.u32.totalorder %s1803_s16, %s1798_s21 }
  0x42   : > { %p1807_p0 = scmp.lt.u32.totalorder %s1798_s21, %s2134_s9 }
  0x43   : > { %p1801_p6 = pnand %p1799_p5, %p2095_p13  ;;  %p1806_p12 = por %p1805_p9, %p1804_p8 }
  0x45   : > { %p1802_p7 = pneg %p1801_p6  ;;  %p1808_p2 = por %p1807_p0, %p1806_p12 }
  0x47   : > { %p1809_p3 = pnand %p1808_p2, %p1802_p7 }
  0x49   : > { %1812 = shalt.err (!%p1809_p3)
}
  0x4a   : > { %s1813_s26 = scalar_lea.vmem %s2136_s27, 2048  ;;  %s1976_s28 = smov [#allocation10]  }
  0x4b   : > { %p1814_p1 = scmp.ne.s32.totalorder %s2136_s27, %s1813_s26  ;;  %s1818_s8 = sshll.u32 %s1976_s28, 4  ;;  %s1819_s8 = int_to_ptr.vmem [resolvable:$false] %s1818_s8 }
  0x4c   : > { %s1820_s14 = scalar_lea.vmem %s1819_s8, 4096  ;;  %p1821_p6 = scmp.lt.s32.totalorder %s2136_s27, %s1819_s8 }
  0x4d   : > { %p1816_p10 = pnand %p1814_p1, %p2095_p13  ;;  %p1822_p4 = scmp.lt.s32.totalorder %s1820_s14, %s1813_s26 }
  0x4f   : > { %p1817_p5 = pneg %p1816_p10  ;;  %p1823_p8 = por %p1822_p4, %p1821_p6 }
  0x51   : > { %p1824_p9 = pnand %p1823_p8, %p1817_p5 }
  0x53   : > { %1827 = shalt.err (!%p1824_p9)
}
  0x54   : > { %s1977_s21 = smov 128   ;;  %s1978_s15 = smov 8  }
  0x55   : > { %1588 = dma.hbm_to_vmem [thread:$0]  (!%p2075_p11), %s2134_s9, 2048, %s2136_s27, %s144_s18, %s1977_s21, %s1977_s21, %s1978_s15  }
  0x56   : > { %s2170_s19 = scalar_lea.hbm %s3256_s3, %s1563_s25  ;;  %s190_s26 = scalar_lea.vmem [#allocation15], %s1519_s20 }
  0x57   : > { %s197_s28 = sshll.u32 %s190_s26, 4  ;;  %s1828_s8 = scalar_lea.hbm %s2170_s19, 2048  ;;  %s2174_s28 = int_to_ptr.vmem [resolvable:$true] %s197_s28 }
  0x58   : > { %p1829_p4 = scmp.ne.s32.totalorder %s2170_s19, %s1828_s8  ;;  %s1833_s9 = scalar_lea.hbm %s3256_s3, 4096 }
  0x59   : > { %p1834_p0 = scmp.lt.u32.totalorder %s2170_s19, %s3256_s3  ;;  %p1835_p2 = scmp.lt.u32.totalorder %s1833_s9, %s1828_s8 }
  0x5a   : > { %p1831_p7 = pnand %p1829_p4, %p2095_p13  ;;  %p1837_p1 = scmp.lt.u32.totalorder %s1828_s8, %s2170_s19 }
  0x5b   : > { %p1836_p3 = por %p1835_p2, %p1834_p0 }
  0x5c   : > { %p1832_p12 = pneg %p1831_p7 }
  0x5d   : > { %p1838_p10 = por %p1837_p1, %p1836_p3 }
  0x5f   : > { %p1839_p5 = pnand %p1838_p10, %p1832_p12 }
  0x61   : > { %1842 = shalt.err (!%p1839_p5)
}
  0x62   : > { %s1843_s12 = scalar_lea.vmem %s2174_s28, 2048  ;;  %s1979_s20 = smov [#allocation15]  }
  0x63   : > { %p1844_p6 = scmp.ne.s32.totalorder %s2174_s28, %s1843_s12  ;;  %s1848_s14 = sshll.u32 %s1979_s20, 4  ;;  %s1849_s14 = int_to_ptr.vmem [resolvable:$false] %s1848_s14 }
  0x64   : > { %s1850_s16 = scalar_lea.vmem %s1849_s14, 4096  ;;  %p1851_p4 = scmp.lt.s32.totalorder %s2174_s28, %s1849_s14 }
  0x65   : > { %p1846_p8 = pnand %p1844_p6, %p2095_p13  ;;  %p1852_p7 = scmp.lt.s32.totalorder %s1850_s16, %s1843_s12 }
  0x67   : > { %p1847_p9 = pneg %p1846_p8  ;;  %p1853_p0 = por %p1852_p7, %p1851_p4 }
  0x69   : > { %p1854_p2 = pnand %p1853_p0, %p1847_p9 }
  0x6b   : > { %1857 = shalt.err (!%p1854_p2)
}
  0x6c   : > { %1594 = dma.hbm_to_vmem [thread:$0]  (!%p2075_p11), %s2170_s19, 2048, %s2174_s28, %s2089_s22, %s1977_s21, %s1977_s21, %s1978_s15  }
  0x6d   : > { %p3300_p13 = scmp.ne.s32.totalorder %s3298_s23, 0 }
  0x6f   : > { %209 = sbr.rel (%p3300_p13) target bundleno = 1469 (0x5bd), region = 32 }
  0x76   : > { %s211_s24 = sand.u32 1, %s1954_s29   ;;  %p3301_p12 = scmp.ne.s32.totalorder %s3295_s11, 0 }
  0x77   : > { %s1530_s17 = sshll.u32 %s211_s24, 7  ;;  %s212_s26 = scalar_lea.sflag [#allocation11], %s211_s24 }
  0x78   : > { %s2204_s8 = scalar_lea.vmem [#allocation10], %s1530_s17 }
  0x79   : > { %1935 = dma.done.wait (%p3301_p12), %s212_s26, 2048  }
  0x7a   : > { %1937 = vsyncadd (%p3301_p12), %s212_s26, 4294965248  ;;  %s220_s13 = sand.u32 1, %s2051_s0   ;;  %s1531_s6 = sshll.u32 %s211_s24, 8 }
  0x7b   : > { %s221_s22 = scalar_lea.sflag [#allocation14], %s220_s13  ;;  %s2211_s21 = scalar_lea.vmem [#allocation13], %s1531_s6 }
  0x7c   : > { %1939 = dma.done.wait (%p3301_p12), %s221_s22, 6144  }
  0x7d   : > { %1941 = vsyncadd (%p3301_p12), %s221_s22, 4294961152  ;;  %s2217_s23 = scalar_lea.vmem [#allocation15], %s1530_s17  ;;  %p1533_p11 = scmp.ne.s32.totalorder %s2051_s0, 0 }
  0x7e   : > { %vm268_vm0 = vcmask (!%p1533_p11), 0   ;;  %v1980_v0 = vmov (!%p1533_p11), 0.0  }
  0x7f   : > { %267 = sbr.rel (%p1533_p11) target bundleno = 134 (0x86), region = 48  ;;  %269 = vst.msk [vmem:[#allocation4] sm:$0x1] (!%p1533_p11), %vm268_vm0, %v1980_v0  ;;  %270 = vst.msk [vmem:[#allocation5] sm:$0x1] (!%p1533_p11), %vm268_vm0, %v1980_v0 }
  0x80   : > { %271 = vst.msk [vmem:[#allocation6] sm:$0x1] (!%p1533_p11), %vm268_vm0, %v1980_v0  ;;  %272 = vst.msk [vmem:[#allocation7] sm:$0x1] (!%p1533_p11), %vm268_vm0, %v1980_v0 }
  0x86 PF: > { %s2221_s19 = smov 0  }
  0x87 LB: >> { %s3302_s15 = sshll.u32 %s2051_s0, 7  ;;  %s288_s28 = sshrl.u32 %s1966_s19, 3  ;;  %s1966_s19 = sphi %s2221_s19, %s279_s19  }
  0x88   : >> { %s280_s11 = sadd.s32 %s1966_s19, %s3302_s15  ;;  %s289_s9 = sand.u32 7, %s1966_s19  }
  0x89   : >> { %s281_s27 = sld [smem:[#allocation9 + %s280_s11]]  ;;  %s1537_s25 = sshll.u32 %s288_s28, 4 }
  0x8a   : >> { %s291_s18 = sadd.s32 %s1537_s25, %s289_s9  ;;  %s1860_s28 = scalar_lea.hbm %s3257_s4, 8192 }
  0x8b   : >> { %s292_s12 = scalar_lea.vmem [#allocation2], %s291_s18 }
  0x8c   : >> { %s294_s20 = sshll.u32 %s292_s12, 4  ;;  %s2231_s20 = int_to_ptr.vmem [resolvable:$true] %s294_s20 }
  0x8f   : >> { %s282_s14 = sshrl.u32 %s281_s27, 3  ;;  %s283_s16 = sand.u32 7, %s281_s27  }
  0x90   : >> { %s1535_s24 = sshll.u32 %s282_s14, 4 }
  0x91   : >> { %s285_s17 = sadd.s32 %s1535_s24, %s283_s16 }
  0x92   : >> { %s1536_s26 = sshll.u32 %s285_s17, 4 }
  0x93   : >> { %s287_s22 = scalar_lea.hbm %s3257_s4, %s1536_s26 }
  0x94   : >> { %s1858_s1 = scalar_lea.hbm %s287_s22, 32  ;;  %p1861_p1 = scmp.lt.u32.totalorder %s287_s22, %s3257_s4 }
  0x95   : >> { %p1859_p3 = scmp.ne.s32.totalorder %s287_s22, %s1858_s1  ;;  %p1862_p10 = scmp.lt.u32.totalorder %s1860_s28, %s1858_s1 }
  0x96   : >> { %p1864_p6 = scmp.lt.u32.totalorder %s1858_s1, %s287_s22 }
  0x97   : >> { %p1863_p5 = por %p1862_p10, %p1861_p1 }
  0x99   : >> { %p1865_p8 = por %p1864_p6, %p1863_p5 }
  0x9b   : >> { %p1866_p9 = pnand %p1865_p8, %p1859_p3 }
  0x9d   : >> { %1869 = shalt.err (!%p1866_p9)  }
  0x9e   : >> { %s1870_s27 = scalar_lea.vmem %s2231_s20, 32  ;;  %s1981_s18 = smov [#allocation2]  }
  0x9f   : >> { %p1871_p4 = scmp.ne.s32.totalorder %s2231_s20, %s1870_s27  ;;  %s1872_s12 = sshll.u32 %s1981_s18, 4  ;;  %s1873_s12 = int_to_ptr.vmem [resolvable:$false] %s1872_s12 }
  0xa0   : >> { %s1874_s15 = scalar_lea.vmem %s1873_s12, 4096  ;;  %p1875_p7 = scmp.lt.s32.totalorder %s2231_s20, %s1873_s12 }
  0xa1   : >> { %p1876_p0 = scmp.lt.s32.totalorder %s1874_s15, %s1870_s27 }
  0xa3   : >> { %p1877_p2 = por %p1876_p0, %p1875_p7 }
  0xa5   : >> { %p1878_p13 = pnand %p1877_p2, %p1871_p4 }
  0xa7   : >> { %1881 = shalt.err (!%p1878_p13)  }
  0xa8   : >> { %s1982_s14 = smov 128   ;;  %s1983_s1 = smov 1  }
  0xa9   : >> { %297 = dma.hbm_to_vmem [thread:$0]  %s287_s22, 32, %s2231_s20, [#allocation3], %s1982_s14, %s1982_s14, %s1983_s1 }
  0xaa   : >> { %s279_s19 = sadd.s32 1, %s1966_s19  }
  0xab   : >> { %p276_p12 = scmp.ge.s32.totalorder %s279_s19, 128  }
  0xac   : > { %v300_v1 = vld [vmem:[%s2204_s8 + $0x10] sm:$0xff] (%p276_p12)  ;;  %v298_v2 = vld [vmem:[%s2204_s8] sm:$0xff] (%p276_p12)  ;;  %v1984_v3 = vmov (%p276_p12), 0   ;;  %v301_v4 = vld [vmem:[%s2204_s8 + $0x18] sm:$0xff] (%p276_p12)  ;;  %v3260_v18 = vlaneseq (%p276_p12) }
  0xad   : > { %278 = sbr.rel (!%p276_p12) target bundleno = 135 (0x87), region = 117  ;;  %1661 = vset.pattern.permute.xlu1 (%p276_p12), %v1984_v3  ;;  %1660 = vset.pattern.permute.xlu0 (%p276_p12), %v1984_v3  ;;  %v299_v5 = vld [vmem:[%s2204_s8 + $0x8] sm:$0xff] (%p276_p12)  ;;  %v302_v7 = vld [vmem:[%s2204_s8 + $0x20] sm:$0xff] (%p276_p12)  ;;  %v305_v8 = vld [vmem:[%s2204_s8 + $0x38] sm:$0xff] (%p276_p12) }
  0xae   : > { %372 = vperm.xlu1 (%p276_p12), %1661, %v300_v1   ;;  %366 = vperm.xlu0 (%p276_p12), %1660, %v298_v2   ;;  %v303_v6 = vld [vmem:[%s2204_s8 + $0x28] sm:$0xff] (%p276_p12)  ;;  %v304_v9 = vld [vmem:[%s2204_s8 + $0x30] sm:$0xff] (%p276_p12)  ;;  %v306_v11 = vld [vmem:[%s2204_s8 + $0x40] sm:$0xff] (%p276_p12)  ;;  %v2266_v19 = vand.u32 (%p276_p12), 127, %v3260_v18 }
  0xaf   : > { %v307_v10 = vld [vmem:[%s2204_s8 + $0x48] sm:$0xff] (%p276_p12)  ;;  %v309_v12 = vld [vmem:[%s2204_s8 + $0x58] sm:$0xff] (%p276_p12)  ;;  %v308_v13 = vld [vmem:[%s2204_s8 + $0x50] sm:$0xff] (%p276_p12) }
  0xb0   : > { %v311_v14 = vld [vmem:[%s2204_s8 + $0x68] sm:$0xff] (%p276_p12)  ;;  %v310_v15 = vld [vmem:[%s2204_s8 + $0x60] sm:$0xff] (%p276_p12)  ;;  %v313_v16 = vld [vmem:[%s2204_s8 + $0x78] sm:$0xff] (%p276_p12)  ;;  %v2269_v20 = vadd.s32 (%p276_p12), 128, %v2266_v19 }
  0xb1   : > { %v312_v17 = vld [vmem:[%s2204_s8 + $0x70] sm:$0xff] (%p276_p12)  ;;  %v2272_v21 = vld [vmem:[%s2211_s21] sm:$0xff] (%p276_p12)  ;;  %v2275_v22 = vld [vmem:[%s2211_s21 + $0x8] sm:$0xff] (%p276_p12) }
  0xb2   : > { %375 = vperm.xlu1 (%p276_p12), %1661, %v301_v4   ;;  %369 = vperm.xlu0 (%p276_p12), %1660, %v299_v5   ;;  %v2278_v23 = vld [vmem:[%s2211_s21 + $0x20] sm:$0xff] (%p276_p12)  ;;  %v2281_v24 = vld [vmem:[%s2211_s21 + $0x28] sm:$0xff] (%p276_p12)  ;;  %v2292_v32 = vld [vmem:[%s2211_s21 + $0x10] sm:$0xff] (%p276_p12) }
  0xb3   : > { %v2295_v33 = vld [vmem:[%s2211_s21 + $0x18] sm:$0xff] (%p276_p12)  ;;  %v2302_v37 = vld [vmem:[%s2211_s21 + $0x30] sm:$0xff] (%p276_p12)  ;;  %v2310_v42 = vld [vmem:[%s2211_s21 + $0x40] sm:$0xff] (%p276_p12) }
  0xb4   : > { %v2305_v38 = vld [vmem:[%s2211_s21 + $0x38] sm:$0xff]  ;;  %3303 = vst [vmem:[#allocation23_spill] sm:$0xff] %v2310_v42  ;;  %v2313_v43 = vld [vmem:[%s2211_s21 + $0x48] sm:$0xff]  ;;  %v2322_v48 = vld [vmem:[%s2211_s21 + $0x50] sm:$0xff] }
  0xb5   : > { %3304 = vst [vmem:[#allocation24_spill] sm:$0xff] %v2313_v43  ;;  %3305 = vst [vmem:[#allocation25_spill] sm:$0xff] %v2322_v48  ;;  %v2325_v49 = vld [vmem:[%s2211_s21 + $0x58] sm:$0xff]  ;;  %v2330_v54 = vld [vmem:[%s2211_s21 + $0x60] sm:$0xff] }
  0xb6   : > { %381 = vperm.xlu1 %1661, %v303_v6   ;;  %378 = vperm.xlu0 %1660, %v302_v7   ;;  %3306 = vst [vmem:[#allocation26_spill] sm:$0xff] %v2325_v49  ;;  %3307 = vst [vmem:[#allocation27_spill] sm:$0xff] %v2330_v54  ;;  %v2333_v55 = vld [vmem:[%s2211_s21 + $0x68] sm:$0xff]  ;;  %v2346_v60 = vld [vmem:[%s2211_s21 + $0x70] sm:$0xff] }
  0xb7   : > { %3308 = vst [vmem:[#allocation28_spill] sm:$0xff] %v2333_v55  ;;  %3309 = vst [vmem:[#allocation29_spill] sm:$0xff] %v2346_v60  ;;  %v2349_v61 = vld [vmem:[%s2211_s21 + $0x78] sm:$0xff]  ;;  %v2354_v2 = vld [vmem:[%s2211_s21 + $0x80] sm:$0xff] }
  0xb8   : > { %3310 = vst [vmem:[#allocation30_spill] sm:$0xff] %v2349_v61  ;;  %3311 = vst [vmem:[#allocation31_spill] sm:$0xff] %v2354_v2  ;;  %v2357_v3 = vld [vmem:[%s2211_s21 + $0x88] sm:$0xff] }
  0xb9   : > { %3312 = vst [vmem:[#allocation32_spill] sm:$0xff] %v2357_v3 }
  0xba   : > { %387 = vperm.xlu1 %1661, %v305_v8   ;;  %384 = vperm.xlu0 %1660, %v304_v9   ;;  %v2370_v8 = vld [vmem:[%s2211_s21 + $0x90] sm:$0xff]  ;;  %v2373_v9 = vld [vmem:[%s2211_s21 + $0x98] sm:$0xff] }
  0xbb   : > { %3313 = vst [vmem:[#allocation33_spill] sm:$0xff] %v2370_v8  ;;  %3314 = vst [vmem:[#allocation34_spill] sm:$0xff] %v2373_v9 }
  0xbe   : > { %393 = vperm.xlu1 %1661, %v307_v10   ;;  %390 = vperm.xlu0 %1660, %v306_v11   ;;  %v2376_v10 = vld [vmem:[%s2217_s23] sm:$0xff] }
  0xbf   : > { %3315 = vst [vmem:[#allocation35_spill] sm:$0xff] %v2376_v10 }
  0xc2   : > { %399 = vperm.xlu1 %1661, %v309_v12   ;;  %396 = vperm.xlu0 %1660, %v308_v13  }
  0xc6   : > { %405 = vperm.xlu1 %1661, %v311_v14   ;;  %402 = vperm.xlu0 %1660, %v310_v15   ;;  %v2381_v15 = vld [vmem:[%s2211_s21 + $0xa0] sm:$0xff] }
  0xc7   : > { %3316 = vst [vmem:[#allocation36_spill] sm:$0xff] %v2381_v15 }
  0xca   : > { %411 = vperm.xlu1 %1661, %v313_v16   ;;  %408 = vperm.xlu0 %1660, %v312_v17   ;;  %v2384_v16 = vld [vmem:[%s2211_s21 + $0xa8] sm:$0xff] }
  0xcb   : > { %3317 = vst [vmem:[#allocation37_spill] sm:$0xff] %v2384_v16 }
 0x12d   : > { %v373_v25 = vpop.permute.xlu1 %372  ;;  %v367_v26 = vpop.permute.xlu0 %366 }
 0x12e   : > { %vm417_vm1 = vcmp.eq.s32.totalorder %v2266_v19, %v373_v25  ;;  %vm418_vm2 = vcmp.eq.s32.totalorder %v2269_v20, %v373_v25  ;;  %vm413_vm3 = vcmp.eq.s32.totalorder %v2266_v19, %v367_v26  ;;  %vm414_vm4 = vcmp.eq.s32.totalorder %v2269_v20, %v367_v26 }
 0x12f   : > { %v445_v27 = vsel %vm413_vm3, %v2272_v21, 0.0  ;;  %v446_v28 = vsel %vm414_vm4, %v2275_v22, 0.0  ;;  %v449_v29 = vsel %vm417_vm1, %v2278_v23, 0.0  ;;  %v450_v30 = vsel %vm418_vm2, %v2281_v24, 0.0 }
 0x130   : > { %v477_v31 = vadd.f32 %v446_v28, %v445_v27  ;;  %v483_v36 = vadd.f32 %v450_v30, %v449_v29  ;;  %vm558_vm1 = vcmask 7168   ;;  %v2399_v29 = vld [vmem:[%s2211_s21 + $0xb0] sm:$0xff]  ;;  %v2402_v30 = vld [vmem:[%s2211_s21 + $0xb8] sm:$0xff] }
 0x131   : > { %v376_v34 = vpop.permute.xlu1 %375  ;;  %v370_v35 = vpop.permute.xlu0 %369  ;;  %v604_v28 = vsel %vm558_vm1, %v2376_v10, 0.0 }
 0x132   : > { %vm419_vm5 = vcmp.eq.s32.totalorder %v2266_v19, %v376_v34  ;;  %vm420_vm6 = vcmp.eq.s32.totalorder %v2269_v20, %v376_v34  ;;  %vm415_vm7 = vcmp.eq.s32.totalorder %v2266_v19, %v370_v35  ;;  %vm416_vm8 = vcmp.eq.s32.totalorder %v2269_v20, %v370_v35  ;;  %478 = vadd.xlane.f32.xlu0 %v477_v31  ;;  %v2405_v31 = vld [vmem:[%s2217_s23 + $0x8] sm:$0xff] }
 0x133   : > { %v447_v39 = vsel %vm415_vm7, %v2292_v32, 0.0  ;;  %v448_v40 = vsel %vm416_vm8, %v2295_v33, 0.0  ;;  %v451_v46 = vsel %vm419_vm5, %v2302_v37, 0.0  ;;  %v452_v47 = vsel %vm420_vm6, %v2305_v38, 0.0  ;;  %3318 = vst [vmem:[#allocation38_spill] sm:$0xff] %v2405_v31 }
 0x134   : > { %v480_v41 = vadd.f32 %v448_v40, %v447_v39  ;;  %v486_v52 = vadd.f32 %v452_v47, %v451_v46  ;;  %v2410_v40 = vld [vmem:[%s2211_s21 + $0xc0] sm:$0xff] }
 0x135   : > { %v382_v44 = vpop.permute.xlu1 %381  ;;  %v379_v45 = vpop.permute.xlu0 %378  ;;  %3319 = vst [vmem:[#allocation39_spill] sm:$0xff] %v2410_v40 }
 0x136   : > { %vm423_vm9 = vcmp.eq.s32.totalorder %v2266_v19, %v382_v44  ;;  %vm424_vm10 = vcmp.eq.s32.totalorder %v2269_v20, %v382_v44  ;;  %vm421_vm11 = vcmp.eq.s32.totalorder %v2266_v19, %v379_v45  ;;  %vm422_vm12 = vcmp.eq.s32.totalorder %v2269_v20, %v379_v45  ;;  %484 = vadd.xlane.f32.xlu0 %v483_v36  ;;  %v2418_v45 = vld [vmem:[%s2217_s23 + $0x10] sm:$0xff] }
 0x137   : > { %481 = vadd.xlane.f32.xlu1 %v480_v41  ;;  %v453_v50 = vsel %vm421_vm11, %v2310_v42, 0.0  ;;  %v454_v51 = vsel %vm422_vm12, %v2313_v43, 0.0  ;;  %v455_v58 = vsel %vm423_vm9, %v2322_v48, 0.0  ;;  %v456_v59 = vsel %vm424_vm10, %v2325_v49, 0.0  ;;  %v2413_v41 = vld [vmem:[%s2211_s21 + $0xc8] sm:$0xff]  ;;  %3321 = vst [vmem:[#allocation41_spill] sm:$0xff] %v2418_v45 }
 0x138   : > { %v489_v53 = vadd.f32 %v454_v51, %v453_v50  ;;  %v492_v0 = vadd.f32 %v456_v59, %v455_v58  ;;  %3320 = vst [vmem:[#allocation40_spill] sm:$0xff] %v2413_v41  ;;  %v605_v44 = vsel %vm558_vm1, %v2405_v31, 0.0  ;;  %v2439_v58 = vld [vmem:[%s2217_s23 + $0x18] sm:$0xff] }
 0x139   : > { %v388_v56 = vpop.permute.xlu1 %387  ;;  %v385_v57 = vpop.permute.xlu0 %384  ;;  %3322 = vst [vmem:[#allocation42_spill] sm:$0xff] %v2439_v58 }
 0x13a   : > { %vm427_vm13 = vcmp.eq.s32.totalorder %v2266_v19, %v388_v56  ;;  %vm428_vm14 = vcmp.eq.s32.totalorder %v2269_v20, %v388_v56  ;;  %vm425_vm15 = vcmp.eq.s32.totalorder %v2266_v19, %v385_v57  ;;  %vm426_vm0 = vcmp.eq.s32.totalorder %v2269_v20, %v385_v57  ;;  %487 = vadd.xlane.f32.xlu0 %v486_v52  ;;  %v2433_v56 = vld [vmem:[%s2211_s21 + $0xd0] sm:$0xff]  ;;  %v2436_v57 = vld [vmem:[%s2211_s21 + $0xd8] sm:$0xff] }
 0x13b   : > { %490 = vadd.xlane.f32.xlu1 %v489_v53  ;;  %v457_v62 = vsel %vm425_vm15, %v2330_v54, 0.0  ;;  %v458_v63 = vsel %vm426_vm0, %v2333_v55, 0.0  ;;  %v459_v6 = vsel %vm427_vm13, %v2346_v60, 0.0  ;;  %v460_v7 = vsel %vm428_vm14, %v2349_v61, 0.0 }
 0x13c   : > { %v495_v1 = vadd.f32 %v458_v63, %v457_v62  ;;  %v498_v13 = vadd.f32 %v460_v7, %v459_v6  ;;  %v606_v52 = vadd.f32 %v605_v44, %v604_v28  ;;  %v607_v53 = vsel %vm558_vm1, %v2418_v45, 0.0  ;;  %v2450_v6 = vld [vmem:[%s2217_s23 + $0x20] sm:$0xff]  ;;  %v2478_v44 = vld [vmem:[%s2217_s23 + $0x30] sm:$0xff] }
 0x13d   : > { %v394_v4 = vpop.permute.xlu1 %393  ;;  %v391_v5 = vpop.permute.xlu0 %390  ;;  %3323 = vst [vmem:[#allocation43_spill] sm:$0xff] %v2450_v6  ;;  %3326 = vst [vmem:[#allocation46_spill] sm:$0xff] %v2478_v44 }
 0x13e   : > { %vm431_vm2 = vcmp.eq.s32.totalorder %v2266_v19, %v394_v4  ;;  %vm432_vm3 = vcmp.eq.s32.totalorder %v2269_v20, %v394_v4  ;;  %vm429_vm4 = vcmp.eq.s32.totalorder %v2266_v19, %v391_v5  ;;  %vm430_vm5 = vcmp.eq.s32.totalorder %v2269_v20, %v391_v5  ;;  %493 = vadd.xlane.f32.xlu0 %v492_v0  ;;  %v2447_v4 = vld [vmem:[%s2211_s21 + $0xe8] sm:$0xff] }
 0x13f   : > { %496 = vadd.xlane.f32.xlu1 %v495_v1  ;;  %v461_v11 = vsel %vm429_vm4, %v2354_v2, 0.0  ;;  %v462_v12 = vsel %vm430_vm5, %v2357_v3, 0.0  ;;  %v463_v26 = vsel %vm431_vm2, %v2370_v8, 0.0  ;;  %v464_v27 = vsel %vm432_vm3, %v2373_v9, 0.0  ;;  %v2444_v1 = vld [vmem:[%s2211_s21 + $0xe0] sm:$0xff] }
 0x140   : > { %v501_v14 = vadd.f32 %v462_v12, %v461_v11  ;;  %v504_v36 = vadd.f32 %v464_v27, %v463_v26  ;;  %v608_v5 = vadd.f32 %v607_v53, %v606_v52  ;;  %v2471_v26 = vld [vmem:[%s2217_s23 + $0x28] sm:$0xff]  ;;  %v2489_v52 = vld [vmem:[%s2217_s23 + $0x38] sm:$0xff]  ;;  %v615_v53 = vsel %vm558_vm1, %v2478_v44, 0.0 }
 0x141   : > { %v400_v17 = vpop.permute.xlu1 %399  ;;  %v397_v25 = vpop.permute.xlu0 %396  ;;  %3325 = vst [vmem:[#allocation45_spill] sm:$0xff] %v2471_v26  ;;  %3327 = vst [vmem:[#allocation47_spill] sm:$0xff] %v2489_v52  ;;  %vm601_vm3 = vcmask 0  }
 0x142   : > { %vm435_vm6 = vcmp.eq.s32.totalorder %v2266_v19, %v400_v17  ;;  %vm436_vm7 = vcmp.eq.s32.totalorder %v2269_v20, %v400_v17  ;;  %vm433_vm8 = vcmp.eq.s32.totalorder %v2266_v19, %v397_v25  ;;  %vm434_vm9 = vcmp.eq.s32.totalorder %v2269_v20, %v397_v25  ;;  %499 = vadd.xlane.f32.xlu0 %v498_v13  ;;  %v2465_v17 = vld [vmem:[%s2211_s21 + $0xf0] sm:$0xff]  ;;  %v2468_v25 = vld [vmem:[%s2211_s21 + $0xf8] sm:$0xff] }
 0x143   : > { %502 = vadd.xlane.f32.xlu1 %v501_v14  ;;  %v465_v34 = vsel %vm433_vm8, %v2381_v15, 0.0  ;;  %v466_v35 = vsel %vm434_vm9, %v2384_v16, 0.0  ;;  %v467_v50 = vsel %vm435_vm6, %v2399_v29, 0.0  ;;  %v468_v51 = vsel %vm436_vm7, %v2402_v30, 0.0  ;;  %3324 = vst [vmem:[#allocation44_spill] sm:$0xff] %v2468_v25 }
 0x144   : > { %v507_v39 = vadd.f32 %v466_v35, %v465_v34  ;;  %v510_v63 = vadd.f32 %v468_v51, %v467_v50  ;;  %v609_v14 = vsel %vm558_vm1, %v2439_v58, 0.0  ;;  %v611_v34 = vsel %vm558_vm1, %v2450_v6, 0.0 }
 0x145   : > { %v406_v46 = vpop.permute.xlu1 %405  ;;  %v403_v47 = vpop.permute.xlu0 %402  ;;  %v613_v50 = vsel %vm558_vm1, %v2471_v26, 0.0 }
 0x146   : > { %vm439_vm10 = vcmp.eq.s32.totalorder %v2266_v19, %v406_v46  ;;  %vm440_vm11 = vcmp.eq.s32.totalorder %v2269_v20, %v406_v46  ;;  %vm437_vm12 = vcmp.eq.s32.totalorder %v2266_v19, %v403_v47  ;;  %vm438_vm13 = vcmp.eq.s32.totalorder %v2269_v20, %v403_v47  ;;  %505 = vadd.xlane.f32.xlu0 %v504_v36 }
 0x147   : > { %508 = vadd.xlane.f32.xlu1 %v507_v39  ;;  %v469_v59 = vsel %vm437_vm12, %v2410_v40, 0.0  ;;  %v470_v62 = vsel %vm438_vm13, %v2413_v41, 0.0  ;;  %v471_v12 = vsel %vm439_vm10, %v2433_v56, 0.0  ;;  %v472_v13 = vsel %vm440_vm11, %v2436_v57, 0.0 }
 0x148   : > { %v513_v0 = vadd.f32 %v470_v62, %v469_v59  ;;  %v516_v35 = vadd.f32 %v472_v13, %v471_v12  ;;  %v610_v39 = vadd.f32 %v609_v14, %v608_v5  ;;  %v2494_v62 = vld [vmem:[%s2217_s23 + $0x40] sm:$0xff]  ;;  %v2509_v14 = vld [vmem:[%s2217_s23 + $0x58] sm:$0xff] }
 0x149   : > { %v412_v7 = vpop.permute.xlu1 %411  ;;  %v409_v11 = vpop.permute.xlu0 %408  ;;  %3328 = vst [vmem:[#allocation48_spill] sm:$0xff] %v2494_v62  ;;  %v619_v5 = vsel %vm558_vm1, %v2494_v62, 0.0  ;;  %3331 = vst [vmem:[#allocation51_spill] sm:$0xff] %v2509_v14 }
 0x14a   : > { %vm443_vm14 = vcmp.eq.s32.totalorder %v2266_v19, %v412_v7  ;;  %vm444_vm15 = vcmp.eq.s32.totalorder %v2269_v20, %v412_v7  ;;  %vm441_vm0 = vcmp.eq.s32.totalorder %v2266_v19, %v409_v11  ;;  %vm442_vm2 = vcmp.eq.s32.totalorder %v2269_v20, %v409_v11  ;;  %511 = vadd.xlane.f32.xlu0 %v510_v63  ;;  %v2504_v11 = vld [vmem:[%s2217_s23 + $0x50] sm:$0xff] }
 0x14b   : > { %514 = vadd.xlane.f32.xlu1 %v513_v0  ;;  %v473_v27 = vsel %vm441_vm0, %v2444_v1, 0.0  ;;  %v474_v28 = vsel %vm442_vm2, %v2447_v4, 0.0  ;;  %v475_v46 = vsel %vm443_vm14, %v2465_v17, 0.0  ;;  %v476_v47 = vsel %vm444_vm15, %v2468_v25, 0.0  ;;  %v2499_v0 = vld [vmem:[%s2217_s23 + $0x48] sm:$0xff]  ;;  %3330 = vst [vmem:[#allocation50_spill] sm:$0xff] %v2504_v11 }
 0x14c   : > { %v519_v36 = vadd.f32 %v474_v28, %v473_v27  ;;  %v612_v51 = vadd.f32 %v611_v34, %v610_v39  ;;  %v522_v19 = vadd.f32 %v476_v47, %v475_v46  ;;  %v617_v20 = vsel %vm558_vm1, %v2489_v52, 0.0  ;;  %3329 = vst [vmem:[#allocation49_spill] sm:$0xff] %v2499_v0  ;;  %v2514_v34 = vld [vmem:[%s2217_s23 + $0x60] sm:$0xff]  ;;  %v2519_v39 = vld [vmem:[%s2217_s23 + $0x68] sm:$0xff] }
 0x14d   : > { %v621_v12 = vsel %vm558_vm1, %v2499_v0, 0.0  ;;  %v623_v27 = vsel %vm558_vm1, %v2504_v11, 0.0  ;;  %3332 = vst [vmem:[#allocation52_spill] sm:$0xff] %v2514_v34  ;;  %3333 = vst [vmem:[#allocation53_spill] sm:$0xff] %v2519_v39  ;;  %v627_v46 = vsel %vm558_vm1, %v2514_v34, 0.0 }
 0x14e   : > { %517 = vadd.xlane.f32.xlu0 %v516_v35  ;;  %v614_v59 = vadd.f32 %v613_v50, %v612_v51  ;;  %v625_v35 = vsel %vm558_vm1, %v2509_v14, 0.0  ;;  %v2524_v50 = vld [vmem:[%s2217_s23 + $0x70] sm:$0xff]  ;;  %v629_v51 = vsel %vm558_vm1, %v2519_v39, 0.0 }
 0x14f   : > { %520 = vadd.xlane.f32.xlu1 %v519_v36  ;;  %3334 = vst [vmem:[#allocation54_spill] sm:$0xff] %v2524_v50 }
 0x150   : > { %v616_v63 = vadd.f32 %v615_v53, %v614_v59  ;;  %v2529_v53 = vld [vmem:[%s2217_s23 + $0x78] sm:$0xff]  ;;  %v631_v59 = vsel %vm558_vm1, %v2524_v50, 0.0  ;;  %s1968_s23 = smov 0  }
 0x151   : > { %3335 = vst [vmem:[#allocation55_spill] sm:$0xff] %v2529_v53 }
 0x152   : > { %523 = vadd.xlane.f32.xlu0 %v522_v19  ;;  %v618_v7 = vadd.f32 %v617_v20, %v616_v63  ;;  %v633_v63 = vsel %vm558_vm1, %v2529_v53, 0.0 }
 0x154   : > { %v620_v13 = vadd.f32 %v619_v5, %v618_v7 }
 0x156   : > { %v622_v28 = vadd.f32 %v621_v12, %v620_v13 }
 0x158   : > { %v624_v36 = vadd.f32 %v623_v27, %v622_v28 }
 0x15a   : > { %v626_v47 = vadd.f32 %v625_v35, %v624_v36 }
 0x15c   : > { %v628_v19 = vadd.f32 %v627_v46, %v626_v47 }
 0x15e   : > { %v630_v20 = vadd.f32 %v629_v51, %v628_v19 }
 0x160   : > { %v632_v5 = vadd.f32 %v631_v59, %v630_v20 }
 0x162   : > { %v634_v7 = vadd.f32 %v633_v63, %v632_v5 }
 0x164   : > { %635 = vadd.xlane.f32.xlu0 %v634_v7 }
 0x1bf   : > { %v479_v12 = vpop.xlane.xlu0 %478 }
 0x1c0   : > { %v526_v13 = vsub.f32 0.0, %v479_v12 }
 0x1c2   : > { %v542_v36 = vmul.f32 %v526_v13, %v2376_v10 }
 0x1c3   : > { %v485_v27 = vpop.xlane.xlu0 %484 }
 0x1c4   : > { %v482_v28 = vpop.xlane.xlu1 %481  ;;  %v528_v35 = vsub.f32 0.0, %v485_v27  ;;  %v559_v40 = vsel %vm558_vm1, %v542_v36, 0.0 }
 0x1c5   : > { %v527_v18 = vsub.f32 0.0, %v482_v28 }
 0x1c6   : > { %v544_v47 = vmul.f32 %v528_v35, %v2418_v45 }
 0x1c7   : > { %v543_v46 = vmul.f32 %v527_v18, %v2405_v31  ;;  %v488_v41 = vpop.xlane.xlu0 %487 }
 0x1c8   : > { %v491_v51 = vpop.xlane.xlu1 %490  ;;  %v529_v19 = vsub.f32 0.0, %v488_v41  ;;  %v562_v7 = vsel %vm558_vm1, %v544_v47, 0.0 }
 0x1c9   : > { %v560_v59 = vsel %vm558_vm1, %v543_v46, 0.0  ;;  %v530_v20 = vsub.f32 0.0, %v491_v51 }
 0x1ca   : > { %v561_v63 = vadd.f32 %v560_v59, %v559_v40  ;;  %v545_v5 = vmul.f32 %v529_v19, %v2439_v58 }
 0x1cb   : > { %v546_v12 = vmul.f32 %v530_v20, %v2450_v6  ;;  %v494_v13 = vpop.xlane.xlu0 %493 }
 0x1cc   : > { %v563_v27 = vadd.f32 %v562_v7, %v561_v63  ;;  %v564_v18 = vsel %vm558_vm1, %v545_v5, 0.0  ;;  %v497_v28 = vpop.xlane.xlu1 %496  ;;  %v531_v35 = vsub.f32 0.0, %v494_v13 }
 0x1cd   : > { %v532_v45 = vsub.f32 0.0, %v497_v28  ;;  %v566_v46 = vsel %vm558_vm1, %v546_v12, 0.0 }
 0x1ce   : > { %v565_v41 = vadd.f32 %v564_v18, %v563_v27  ;;  %v547_v36 = vmul.f32 %v531_v35, %v2471_v26 }
 0x1cf   : > { %v548_v40 = vmul.f32 %v532_v45, %v2478_v44  ;;  %v500_v51 = vpop.xlane.xlu0 %499 }
 0x1d0   : > { %v567_v19 = vadd.f32 %v566_v46, %v565_v41  ;;  %v568_v47 = vsel %vm558_vm1, %v547_v36, 0.0  ;;  %v503_v59 = vpop.xlane.xlu1 %502  ;;  %v533_v20 = vsub.f32 0.0, %v500_v51 }
 0x1d1   : > { %v534_v6 = vsub.f32 0.0, %v503_v59  ;;  %v570_v7 = vsel %vm558_vm1, %v548_v40, 0.0 }
 0x1d2   : > { %v569_v63 = vadd.f32 %v568_v47, %v567_v19  ;;  %v549_v5 = vmul.f32 %v533_v20, %v2489_v52 }
 0x1d3   : > { %v550_v13 = vmul.f32 %v534_v6, %v2494_v62  ;;  %v506_v27 = vpop.xlane.xlu0 %505 }
 0x1d4   : > { %v571_v18 = vadd.f32 %v570_v7, %v569_v63  ;;  %v572_v12 = vsel %vm558_vm1, %v549_v5, 0.0  ;;  %v509_v28 = vpop.xlane.xlu1 %508  ;;  %v535_v45 = vsub.f32 0.0, %v506_v27 }
 0x1d5   : > { %v536_v35 = vsub.f32 0.0, %v509_v28  ;;  %v574_v46 = vsel %vm558_vm1, %v550_v13, 0.0 }
 0x1d6   : > { %v573_v41 = vadd.f32 %v572_v12, %v571_v18  ;;  %v551_v36 = vmul.f32 %v535_v45, %v2499_v0 }
 0x1d7   : > { %v552_v51 = vmul.f32 %v536_v35, %v2504_v11  ;;  %v512_v19 = vpop.xlane.xlu0 %511 }
 0x1d8   : > { %v575_v47 = vadd.f32 %v574_v46, %v573_v41  ;;  %v576_v40 = vsel %vm558_vm1, %v551_v36, 0.0  ;;  %v515_v59 = vpop.xlane.xlu1 %514  ;;  %v537_v6 = vsub.f32 0.0, %v512_v19 }
 0x1d9   : > { %v538_v20 = vsub.f32 0.0, %v515_v59  ;;  %v578_v7 = vsel %vm558_vm1, %v552_v51, 0.0 }
 0x1da   : > { %v577_v63 = vadd.f32 %v576_v40, %v575_v47  ;;  %v553_v5 = vmul.f32 %v537_v6, %v2509_v14 }
 0x1db   : > { %v554_v27 = vmul.f32 %v538_v20, %v2514_v34  ;;  %v518_v18 = vpop.xlane.xlu0 %517 }
 0x1dc   : > { %v579_v12 = vadd.f32 %v578_v7, %v577_v63  ;;  %v580_v13 = vsel %vm558_vm1, %v553_v5, 0.0  ;;  %v521_v28 = vpop.xlane.xlu1 %520  ;;  %v539_v45 = vsub.f32 0.0, %v518_v18 }
 0x1dd   : > { %v540_v35 = vsub.f32 0.0, %v521_v28  ;;  %v582_v46 = vsel %vm558_vm1, %v554_v27, 0.0 }
 0x1de   : > { %v581_v41 = vadd.f32 %v580_v13, %v579_v12  ;;  %v555_v36 = vmul.f32 %v539_v45, %v2519_v39 }
 0x1df   : > { %v556_v19 = vmul.f32 %v540_v35, %v2524_v50  ;;  %v524_v47 = vpop.xlane.xlu0 %523 }
 0x1e0   : > { %v584_v40 = vsel %vm558_vm1, %v555_v36, 0.0  ;;  %v541_v51 = vsub.f32 0.0, %v524_v47  ;;  %v583_v59 = vadd.f32 %v582_v46, %v581_v41 }
 0x1e1   : > { %v586_v63 = vsel %vm558_vm1, %v556_v19, 0.0  ;;  %v525_v19 = vld [vmem:[#allocation5] sm:$0x1] }
 0x1e2   : > { %v557_v6 = vmul.f32 %v541_v51, %v2529_v53  ;;  %v585_v20 = vadd.f32 %v584_v40, %v583_v59 }
 0x1e4   : > { %v587_v5 = vadd.f32 %v586_v63, %v585_v20  ;;  %v588_v7 = vsel %vm558_vm1, %v557_v6, 0.0  ;;  %v603_v6 = vld [vmem:[#allocation6] sm:$0x1] }
 0x1e6   : > { %v589_v18 = vadd.f32 %v588_v7, %v587_v5 }
 0x1e8   : > { %590 = vadd.xlane.f32.xlu1 %v589_v18 }
 0x1f1   : > { %v636_v12 = vpop.xlane.xlu0 %635 }
 0x1f2   : > { %v637_v13 = vrot.slane %v636_v12, 4 }
 0x1f4   : > { %v638_v27 = vadd.f32 %v637_v13, %v636_v12 }
 0x1f6   : > { %v639_v28 = vrot.slane %v638_v27, 2 }
 0x1f8   : > { %v640_v36 = vadd.f32 %v639_v28, %v638_v27 }
 0x1fa   : > { %v641_v46 = vrot.slane %v640_v36, 1 }
 0x1fc   : > { %v642_v59 = vadd.f32 %v641_v46, %v640_v36 }
 0x275   : > { %v591_v45 = vpop.xlane.xlu1 %590 }
 0x276   : > { %v592_v35 = vrot.slane %v591_v45, 4 }
 0x278   : > { %v593_v50 = vadd.f32 %v592_v35, %v591_v45 }
 0x27a   : > { %v594_v47 = vrot.slane %v593_v50, 2 }
 0x27c   : > { %v595_v41 = vadd.f32 %v594_v47, %v593_v50 }
 0x27e   : > { %v596_v51 = vrot.slane %v595_v41, 1 }
 0x280   : > { %v597_v40 = vadd.f32 %v596_v51, %v595_v41 }
 0x282   : > { %1567 = vpush %v597_v40 }
 0x283   : > { %1569 = vpush %v642_v59 }
 0x2b3   : > { %s1568_s8 = spop %1567 }
 0x2b4   : > { %v599_v20 = vstv %s1568_s8  ;;  %s1570_s21 = spop %1569 }
 0x2b5   : > { %v600_v63 = vadd.f32 %v599_v20, %v525_v19  ;;  %v644_v5 = vstv %s1570_s21 }
 0x2b6   : > { %v645_v7 = vadd.f32 %v644_v5, %v603_v6 }
 0x2b7   : > { %602 = vst.msk [vmem:[#allocation5] sm:$0x1] %vm601_vm3, %v600_v63 }
 0x2b8   : > { %646 = vst.msk [vmem:[#allocation6] sm:$0x1] %vm601_vm3, %v645_v7 }
 0x2b9 LB: >> { %1942 = dma.done.wait [#allocation3], 32  ;;  %s1970_s23 = sphi %s1968_s23, %s652_s23  }
 0x2ba   : >> { %1943 = vsyncadd [#allocation3], 4294967264  ;;  %s652_s23 = sadd.s32 1, %s1970_s23  }
 0x2bb   : >> { %p649_p11 = scmp.ge.s32.totalorder %s652_s23, 128  }
 0x2bc   : > { %v2569_v50 = vld [vmem:[#allocation2 + $0x20] sm:$0xff] (%p649_p11)  ;;  %v2571_v18 = vld [vmem:[#allocation2 + $0x28] sm:$0xff] (%p649_p11)  ;;  %v2579_v28 = vld [vmem:[#allocation2 + $0x30] sm:$0xff] (%p649_p11)  ;;  %s3354_s19 = sshll.u32 (%p649_p11), %s2051_s0, 7  ;;  %p1554_p3 = scmp.ne.s32.totalorder (%p649_p11), %s2051_s0, 1 }
 0x2bd   : > { %651 = sbr.rel (!%p649_p11) target bundleno = 697 (0x2b9), region = 128  ;;  %v2573_v12 = vld [vmem:[#allocation2] sm:$0xff] (%p649_p11)  ;;  %v694_v13 = vmax.f32 (%p649_p11), %v2569_v50, %v2571_v18  ;;  %v2577_v27 = vld [vmem:[#allocation2 + $0x8] sm:$0xff] (%p649_p11)  ;;  %v2581_v45 = vld [vmem:[#allocation2 + $0x38] sm:$0xff] (%p649_p11) }
 0x2be   : > { %v688_v35 = vmax.f32 (%p649_p11), %v2573_v12, %v2577_v27  ;;  %v2585_v36 = vld [vmem:[#allocation2 + $0x10] sm:$0xff] (%p649_p11)  ;;  %v2587_v47 = vld [vmem:[#allocation2 + $0x18] sm:$0xff] (%p649_p11)  ;;  %v697_v41 = vmax.f32 (%p649_p11), %v2579_v28, %v2581_v45  ;;  %v2597_v59 = vld [vmem:[#allocation2 + $0x40] sm:$0xff] (%p649_p11) }
 0x2bf   : > { %695 = vmax.xlane.f32.xlu1 (%p649_p11), %v694_v13  ;;  %v691_v46 = vmax.f32 (%p649_p11), %v2585_v36, %v2587_v47  ;;  %v2593_v51 = vld [vmem:[#allocation2 + $0x50] sm:$0xff] (%p649_p11)  ;;  %v2595_v40 = vld [vmem:[#allocation2 + $0x58] sm:$0xff] (%p649_p11)  ;;  %v2599_v19 = vld [vmem:[#allocation2 + $0x48] sm:$0xff] (%p649_p11) }
 0x2c0   : > { %689 = vmax.xlane.f32.xlu0 (%p649_p11), %v688_v35  ;;  %v703_v6 = vmax.f32 (%p649_p11), %v2593_v51, %v2595_v40  ;;  %v700_v20 = vmax.f32 (%p649_p11), %v2597_v59, %v2599_v19  ;;  %v2605_v63 = vld [vmem:[#allocation2 + $0x70] sm:$0xff] (%p649_p11)  ;;  %v2607_v5 = vld [vmem:[#allocation2 + $0x78] sm:$0xff] (%p649_p11)  ;;  %v2609_v7 = vld [vmem:[#allocation2 + $0x60] sm:$0xff] (%p649_p11) }
 0x2c1   : > { %v2611_v13 = vld [vmem:[#allocation2 + $0x68] sm:$0xff] (%p649_p11)  ;;  %v709_v35 = vmax.f32 (%p649_p11), %v2605_v63, %v2607_v5  ;;  %v2619_v53 = vld [vmem:[#allocation2 + $0x98] sm:$0xff] (%p649_p11)  ;;  %v2621_v39 = vld [vmem:[#allocation2 + $0x80] sm:$0xff] (%p649_p11) }
 0x2c2   : > { %v2623_v34 = vld [vmem:[#allocation2 + $0x88] sm:$0xff] (%p649_p11)  ;;  %v2629_v11 = vld [vmem:[#allocation2 + $0xb8] sm:$0xff] (%p649_p11)  ;;  %v2633_v0 = vld [vmem:[#allocation2 + $0xa0] sm:$0xff] (%p649_p11) }
 0x2c3   : > { %698 = vmax.xlane.f32.xlu1 (%p649_p11), %v697_v41  ;;  %v706_v41 = vmax.f32 (%p649_p11), %v2609_v7, %v2611_v13  ;;  %v2635_v62 = vld [vmem:[#allocation2 + $0xa8] sm:$0xff] (%p649_p11)  ;;  %v2641_v44 = vld [vmem:[#allocation2 + $0xd8] sm:$0xff] (%p649_p11)  ;;  %v2645_v26 = vld [vmem:[#allocation2 + $0xc0] sm:$0xff] (%p649_p11) }
 0x2c4   : > { %692 = vmax.xlane.f32.xlu0 %v691_v46  ;;  %v2617_v46 = vld [vmem:[#allocation2 + $0x90] sm:$0xff]  ;;  %v2647_v58 = vld [vmem:[#allocation2 + $0xc8] sm:$0xff]  ;;  %v2653_v10 = vld [vmem:[#allocation2 + $0xf8] sm:$0xff]  ;;  %s1986_s24 = smov (!%p1554_p3), 1   ;;  %s1987_s17 = smov (!%p1554_p3), 3  }
 0x2c5   : > { %v715_v14 = vmax.f32 %v2617_v46, %v2619_v53  ;;  %v2657_v16 = vld [vmem:[#allocation2 + $0xe0] sm:$0xff]  ;;  %v2659_v15 = vld [vmem:[#allocation2 + $0xe8] sm:$0xff]  ;;  %s1988_s26 = smov (!%p1554_p3), 2  }
 0x2c7   : > { %704 = vmax.xlane.f32.xlu1 %v703_v6  ;;  %v2627_v6 = vld [vmem:[#allocation2 + $0xb0] sm:$0xff] }
 0x2c8   : > { %701 = vmax.xlane.f32.xlu0 %v700_v20  ;;  %v712_v20 = vmax.f32 %v2621_v39, %v2623_v34  ;;  %v721_v52 = vmax.f32 %v2627_v6, %v2629_v11 }
 0x2cb   : > { %710 = vmax.xlane.f32.xlu1 %v709_v35  ;;  %v2639_v35 = vld [vmem:[#allocation2 + $0xd0] sm:$0xff] }
 0x2cc   : > { %707 = vmax.xlane.f32.xlu0 %v706_v41  ;;  %v718_v41 = vmax.f32 %v2633_v0, %v2635_v62  ;;  %v727_v31 = vmax.f32 %v2639_v35, %v2641_v44 }
 0x2cf   : > { %716 = vmax.xlane.f32.xlu1 %v715_v14  ;;  %v2651_v14 = vld [vmem:[#allocation2 + $0xf0] sm:$0xff] }
 0x2d0   : > { %713 = vmax.xlane.f32.xlu0 %v712_v20  ;;  %v724_v20 = vmax.f32 %v2645_v26, %v2647_v58  ;;  %v733_v9 = vmax.f32 %v2651_v14, %v2653_v10 }
 0x2d3   : > { %722 = vmax.xlane.f32.xlu1 %v721_v52  ;;  %v730_v52 = vmax.f32 %v2657_v16, %v2659_v15 }
 0x2d4   : > { %719 = vmax.xlane.f32.xlu0 %v718_v41 }
 0x2d7   : > { %728 = vmax.xlane.f32.xlu1 %v727_v31 }
 0x2d8   : > { %725 = vmax.xlane.f32.xlu0 %v724_v20 }
 0x2db   : > { %734 = vmax.xlane.f32.xlu1 %v733_v9 }
 0x2dc   : > { %731 = vmax.xlane.f32.xlu0 %v730_v52 }
 0x34c   : > { %v696_v41 = vpop.xlane.xlu1 %695 }
 0x34d   : > { %v740_v8 = vsub.f32 %v2569_v50, %v696_v41  ;;  %v741_v3 = vsub.f32 %v2571_v18, %v696_v41  ;;  %v690_v2 = vpop.xlane.xlu0 %689 }
 0x34e   : > { %v736_v61 = vsub.f32 %v2573_v12, %v690_v2  ;;  %v737_v60 = vsub.f32 %v2577_v27, %v690_v2 }
 0x34f   : > { %v772_v31 = vmul.f32 3.3333333, %v740_v8  ;;  %v773_v55 = vmul.f32 3.3333333, %v741_v3 }
 0x350   : > { %v768_v54 = vmul.f32 3.3333333, %v736_v61  ;;  %v769_v49 = vmul.f32 3.3333333, %v737_v60  ;;  %v699_v20 = vpop.xlane.xlu1 %698 }
 0x351   : > { %v808_v48 = vmul.f32 1.442695, %v772_v31  ;;  %v810_v43 = vmul.f32 1.442695, %v773_v55  ;;  %v742_v9 = vsub.f32 %v2579_v28, %v699_v20  ;;  %v743_v52 = vsub.f32 %v2581_v45, %v699_v20  ;;  %v693_v42 = vpop.xlane.xlu0 %692 }
 0x352   : > { %v800_v50 = vmul.f32 1.442695, %v768_v54  ;;  %v802_v25 = vmul.f32 1.442695, %v769_v49  ;;  %v738_v18 = vsub.f32 %v2585_v36, %v693_v42  ;;  %v739_v12 = vsub.f32 %v2587_v47, %v693_v42 }
 0x353   : > { %1662 = vpow2.f32 %v808_v48  ;;  %v774_v2 = vmul.f32 3.3333333, %v742_v9  ;;  %v775_v8 = vmul.f32 3.3333333, %v743_v52 }
 0x354   : > { %1664 = vpow2.f32 %v810_v43  ;;  %v770_v61 = vmul.f32 3.3333333, %v738_v18  ;;  %v771_v60 = vmul.f32 3.3333333, %v739_v12  ;;  %v705_v3 = vpop.xlane.xlu1 %704 }
 0x355   : > { %1666 = vpow2.f32 %v800_v50  ;;  %v812_v55 = vmul.f32 1.442695, %v774_v2  ;;  %v814_v27 = vmul.f32 1.442695, %v775_v8  ;;  %v746_v28 = vsub.f32 %v2593_v51, %v705_v3  ;;  %v702_v45 = vpop.xlane.xlu0 %701 }
 0x356   : > { %1668 = vpow2.f32 %v802_v25  ;;  %v804_v54 = vmul.f32 1.442695, %v770_v61  ;;  %v806_v49 = vmul.f32 1.442695, %v771_v60  ;;  %v747_v36 = vsub.f32 %v2595_v40, %v705_v3 }
 0x357   : > { %1670 = vpow2.f32 %v812_v55  ;;  %v778_v42 = vmul.f32 3.3333333, %v746_v28  ;;  %v744_v48 = vsub.f32 %v2597_v59, %v702_v45  ;;  %v745_v43 = vsub.f32 %v2599_v19, %v702_v45 }
 0x358   : > { %1672 = vpow2.f32 %v814_v27  ;;  %v779_v47 = vmul.f32 3.3333333, %v747_v36  ;;  %v711_v41 = vpop.xlane.xlu1 %710 }
 0x359   : > { %1674 = vpow2.f32 %v804_v54  ;;  %v820_v31 = vmul.f32 1.442695, %v778_v42  ;;  %v776_v20 = vmul.f32 3.3333333, %v744_v48  ;;  %v777_v9 = vmul.f32 3.3333333, %v745_v43  ;;  %v708_v51 = vpop.xlane.xlu0 %707 }
 0x35a   : > { %1676 = vpow2.f32 %v806_v49  ;;  %v822_v25 = vmul.f32 1.442695, %v779_v47  ;;  %v750_v52 = vsub.f32 %v2605_v63, %v711_v41  ;;  %v751_v40 = vsub.f32 %v2607_v5, %v711_v41 }
 0x35b   : > { %1678 = vpow2.f32 %v820_v31  ;;  %v816_v50 = vmul.f32 1.442695, %v776_v20  ;;  %v818_v18 = vmul.f32 1.442695, %v777_v9  ;;  %v748_v59 = vsub.f32 %v2609_v7, %v708_v51 }
 0x35c   : > { %1680 = vpow2.f32 %v822_v25  ;;  %v782_v19 = vmul.f32 3.3333333, %v750_v52  ;;  %v783_v12 = vmul.f32 3.3333333, %v751_v40  ;;  %v749_v2 = vsub.f32 %v2611_v13, %v708_v51  ;;  %v717_v8 = vpop.xlane.xlu1 %716 }
 0x35d   : > { %v2681_v61 = vpop.eup %1662  ;;  %1682 = vpow2.f32 %v816_v50  ;;  %v780_v60 = vmul.f32 3.3333333, %v748_v59  ;;  %v754_v3 = vsub.f32 %v2617_v46, %v717_v8  ;;  %v755_v63 = vsub.f32 %v2619_v53, %v717_v8  ;;  %v714_v5 = vpop.xlane.xlu0 %713 }
 0x35e   : > { %v2685_v55 = vpop.eup %1664  ;;  %1684 = vpow2.f32 %v818_v18  ;;  %v828_v27 = vmul.f32 1.442695, %v782_v19  ;;  %v830_v7 = vmul.f32 1.442695, %v783_v12  ;;  %v781_v28 = vmul.f32 3.3333333, %v749_v2 }
 0x35f   : > { %v2687_v45 = vpop.eup %1666  ;;  %v824_v54 = vmul.f32 1.442695, %v780_v60  ;;  %v786_v13 = vmul.f32 3.3333333, %v754_v3  ;;  %v787_v49 = vmul.f32 3.3333333, %v755_v63  ;;  %v752_v36 = vsub.f32 %v2621_v39, %v714_v5 }
 0x360   : > { %v2690_v42 = vpop.eup %1668  ;;  %1686 = vpow2.f32 %v828_v27  ;;  %v826_v46 = vmul.f32 1.442695, %v781_v28  ;;  %v723_v48 = vpop.xlane.xlu1 %722  ;;  %v753_v53 = vsub.f32 %v2623_v34, %v714_v5  ;;  %v870_v43 = vadd.f32 %v2685_v55, %v2681_v61 }
 0x361   : > { %v2695_v47 = vpop.eup %1670  ;;  %1688 = vpow2.f32 %v830_v7  ;;  %v836_v41 = vmul.f32 1.442695, %v786_v13  ;;  %v838_v31 = vmul.f32 1.442695, %v787_v49  ;;  %v758_v20 = vsub.f32 %v2627_v6, %v723_v48  ;;  %v720_v9 = vpop.xlane.xlu0 %719 }
 0x362   : > { %v2698_v51 = vpop.eup %1672  ;;  %1690 = vpow2.f32 %v824_v54  ;;  %v759_v39 = vsub.f32 %v2629_v11, %v723_v48  ;;  %v864_v25 = vadd.f32 %v2690_v42, %v2687_v45  ;;  %v784_v34 = vmul.f32 3.3333333, %v752_v36 }
 0x363   : > { %v2703_v52 = vpop.eup %1674  ;;  %1692 = vpow2.f32 %v826_v46  ;;  %v790_v40 = vmul.f32 3.3333333, %v758_v20  ;;  %v785_v50 = vmul.f32 3.3333333, %v753_v53  ;;  %v756_v18 = vsub.f32 %v2633_v0, %v720_v9 }
 0x364   : > { %v2706_v59 = vpop.eup %1676  ;;  %1694 = vpow2.f32 %v836_v41  ;;  %v791_v6 = vmul.f32 3.3333333, %v759_v39  ;;  %865 = vadd.xlane.f32.xlu0 %v864_v25  ;;  %v832_v19 = vmul.f32 1.442695, %v784_v34  ;;  %v729_v12 = vpop.xlane.xlu1 %728  ;;  %v757_v11 = vsub.f32 %v2635_v62, %v720_v9 }
 0x365   : > { %v2709_v2 = vpop.eup %1678  ;;  %1696 = vpow2.f32 %v838_v31  ;;  %v844_v8 = vmul.f32 1.442695, %v790_v40  ;;  %v834_v60 = vmul.f32 1.442695, %v785_v50  ;;  %v762_v3 = vsub.f32 %v2639_v35, %v729_v12  ;;  %v726_v63 = vpop.xlane.xlu0 %725 }
 0x366   : > { %v2712_v5 = vpop.eup %1680  ;;  %v846_v0 = vmul.f32 1.442695, %v791_v6  ;;  %1698 = vpow2.f32 %v832_v19  ;;  %v763_v27 = vsub.f32 %v2641_v44, %v729_v12  ;;  %v867_v7 = vadd.f32 %v2706_v59, %v2703_v52 }
 0x367   : > { %v2717_v28 = vpop.eup %1682  ;;  %1700 = vpow2.f32 %v844_v8  ;;  %v794_v62 = vmul.f32 3.3333333, %v762_v3  ;;  %v788_v54 = vmul.f32 3.3333333, %v756_v18  ;;  %v789_v13 = vmul.f32 3.3333333, %v757_v11 }
 0x368   : > { %v2719_v49 = vpop.eup %1684  ;;  %1702 = vpow2.f32 %v846_v0  ;;  %v795_v35 = vmul.f32 3.3333333, %v763_v27  ;;  %871 = vadd.xlane.f32.xlu0 %v870_v43  ;;  %868 = vadd.xlane.f32.xlu1 %v867_v7  ;;  %v735_v36 = vpop.xlane.xlu1 %734  ;;  %v873_v46 = vadd.f32 %v2698_v51, %v2695_v47  ;;  %v760_v44 = vsub.f32 %v2645_v26, %v726_v63 }
 0x369   : > { %1704 = vpow2.f32 %v834_v60  ;;  %v852_v48 = vmul.f32 1.442695, %v794_v62  ;;  %v840_v53 = vmul.f32 1.442695, %v788_v54  ;;  %v842_v41 = vmul.f32 1.442695, %v789_v13  ;;  %v732_v31 = vpop.xlane.xlu0 %731 }
 0x36a   : > { %v2724_v20 = vpop.eup %1686  ;;  %v854_v9 = vmul.f32 1.442695, %v795_v35  ;;  %v766_v39 = vsub.f32 %v2651_v14, %v735_v36  ;;  %v767_v25 = vsub.f32 %v2653_v10, %v735_v36  ;;  %v876_v43 = vadd.f32 %v2719_v49, %v2717_v28 }
 0x36b   : > { %v2730_v34 = vpop.eup %1688  ;;  %1706 = vpow2.f32 %v852_v48  ;;  %v761_v26 = vsub.f32 %v2647_v58, %v726_v63  ;;  %v792_v40 = vmul.f32 3.3333333, %v760_v44  ;;  %v879_v50 = vadd.f32 %v2712_v5, %v2709_v2 }
 0x36c   : > { %v2735_v18 = vpop.eup %1690  ;;  %1708 = vpow2.f32 %v854_v9  ;;  %v798_v6 = vmul.f32 3.3333333, %v766_v39  ;;  %v799_v19 = vmul.f32 3.3333333, %v767_v25  ;;  %874 = vadd.xlane.f32.xlu1 %v873_v46  ;;  %877 = vadd.xlane.f32.xlu0 %v876_v43  ;;  %v764_v10 = vsub.f32 %v2657_v16, %v732_v31 }
 0x36d   : > { %v2738_v14 = vpop.eup %1692  ;;  %1710 = vpow2.f32 %v840_v53  ;;  %v793_v12 = vmul.f32 3.3333333, %v761_v26  ;;  %v848_v11 = vmul.f32 1.442695, %v792_v40  ;;  %v765_v58 = vsub.f32 %v2659_v15, %v732_v31 }
 0x36e   : > { %v2741_v8 = vpop.eup %1694  ;;  %1712 = vpow2.f32 %v842_v41  ;;  %v860_v60 = vmul.f32 1.442695, %v798_v6  ;;  %v862_v3 = vmul.f32 1.442695, %v799_v19  ;;  %v882_v63 = vadd.f32 %v2738_v14, %v2735_v18 }
 0x36f   : > { %v2745_v0 = vpop.eup %1696  ;;  %1714 = vpow2.f32 %v848_v11  ;;  %v850_v27 = vmul.f32 1.442695, %v793_v12  ;;  %v796_v16 = vmul.f32 3.3333333, %v764_v10  ;;  %v797_v7 = vmul.f32 3.3333333, %v765_v58 }
 0x370   : > { %v2747_v62 = vpop.eup %1698  ;;  %1716 = vpow2.f32 %v860_v60  ;;  %880 = vadd.xlane.f32.xlu1 %v879_v50  ;;  %883 = vadd.xlane.f32.xlu0 %v882_v63  ;;  %v891_v15 = vadd.f32 %v2745_v0, %v2741_v8  ;;  %v885_v46 = vadd.f32 %v2730_v34, %v2724_v20  ;;  %v1012_v11 = vmul.f32 %v2703_v52, %v2292_v32 }
 0x371   : > { %v1701_v54 = vpop.eup %1700  ;;  %1718 = vpow2.f32 %v862_v3  ;;  %v856_v13 = vmul.f32 1.442695, %v796_v16  ;;  %v858_v35 = vmul.f32 1.442695, %v797_v7  ;;  %v1013_v58 = vmul.f32 %v2706_v59, %v2295_v33 }
 0x372   : > { %v1703_v36 = vpop.eup %1702  ;;  %1720 = vpow2.f32 %v850_v27  ;;  %v1014_v3 = vmul.f32 %v2681_v61, %v2278_v23  ;;  %v1015_v63 = vmul.f32 %v2685_v55, %v2281_v24  ;;  %v1010_v27 = vmul.f32 %v2687_v45, %v2272_v21 }
 0x373   : > { %v2753_v44 = vpop.eup %1704  ;;  %1722 = vpow2.f32 %v856_v13  ;;  %v897_v48 = vadd.f32 %v1703_v36, %v1701_v54  ;;  %v1011_v16 = vmul.f32 %v2690_v42, %v2275_v22  ;;  %v1045_v32 = vadd.f32 %v1013_v58, %v1012_v11 }
 0x374   : > { %1724 = vpow2.f32 %v858_v35  ;;  %886 = vadd.xlane.f32.xlu1 %v885_v46  ;;  %892 = vadd.xlane.f32.xlu0 %v891_v15  ;;  %v888_v53 = vadd.f32 %v2753_v44, %v2747_v62  ;;  %v1140_v33 = vmul.f32 %v2703_v52, %v2703_v52  ;;  %v1141_v15 = vmul.f32 %v2706_v59, %v2706_v59 }
 0x375   : > { %v1707_v41 = vpop.eup %1706  ;;  %v1156_v23 = vmul.f32 %v2741_v8, %v2741_v8  ;;  %v1157_v24 = vmul.f32 %v2745_v0, %v2745_v0  ;;  %v1048_v21 = vadd.f32 %v1015_v63, %v1014_v3  ;;  %v1042_v13 = vadd.f32 %v1011_v16, %v1010_v27 }
 0x376   : > { %v1709_v31 = vpop.eup %1708  ;;  %v1138_v22 = vmul.f32 %v2687_v45, %v2687_v45  ;;  %v1139_v35 = vmul.f32 %v2690_v42, %v2690_v42  ;;  %v1016_v52 = vmul.f32 %v2695_v47, %v2302_v37  ;;  %v1017_v46 = vmul.f32 %v2698_v51, %v2305_v38 }
 0x377   : > { %v2757_v9 = vpop.eup %1710  ;;  %v903_v25 = vadd.f32 %v1709_v31, %v1707_v41  ;;  %v2798_v59 = vadd.f32 %v1157_v24, %v1156_v23  ;;  %v1142_v45 = vmul.f32 %v2681_v61, %v2681_v61  ;;  %v1143_v42 = vmul.f32 %v2685_v55, %v2685_v55  ;;  %v3338_v24 = vld [vmem:[#allocation24_spill] sm:$0xff] }
 0x378   : > { %v2759_v39 = vpop.eup %1712  ;;  %898 = vadd.xlane.f32.xlu0 %v897_v48  ;;  %889 = vadd.xlane.f32.xlu1 %v888_v53  ;;  %v1032_v48 = vmul.f32 %v1701_v54, %v2399_v29  ;;  %v1033_v53 = vmul.f32 %v1703_v36, %v2402_v30  ;;  %v1036_v29 = vmul.f32 %v1707_v41, %v2433_v56 }
 0x379   : > { %v2761_v43 = vpop.eup %1714  ;;  %v894_v26 = vadd.f32 %v2759_v39, %v2757_v9  ;;  %v1170_v30 = vadd.f32 %v1139_v35, %v1138_v22  ;;  %v1037_v61 = vmul.f32 %v1709_v31, %v2436_v57  ;;  %v1164_v55 = vmul.f32 %v1707_v41, %v1707_v41  ;;  %v3339_v22 = vld [vmem:[#allocation25_spill] sm:$0xff] }
 0x37a   : > { %v1717_v40 = vpop.eup %1716  ;;  %v1162_v37 = vmul.f32 %v2761_v43, %v2761_v43 }
 0x37b   : > { %v2765_v50 = vpop.eup %1718  ;;  %v2821_v3 = vadd.f32 %v1037_v61, %v1036_v29  ;;  %v1168_v57 = vmul.f32 %v1717_v40, %v1717_v40  ;;  %v3344_v61 = vld [vmem:[#allocation30_spill] sm:$0xff] }
 0x37c   : > { %v2767_v6 = vpop.eup %1720  ;;  %904 = vadd.xlane.f32.xlu0 %v903_v25  ;;  %895 = vadd.xlane.f32.xlu1 %v894_v26  ;;  %v909_v19 = vadd.f32 %v2765_v50, %v1717_v40  ;;  %v1160_v25 = vmul.f32 %v1701_v54, %v1701_v54  ;;  %v1173_v26 = vadd.f32 %v1141_v15, %v1140_v33 }
 0x37d   : > { %v1723_v10 = vpop.eup %1722  ;;  %v900_v12 = vadd.f32 %v2767_v6, %v2761_v43  ;;  %v1163_v38 = vmul.f32 %v2767_v6, %v2767_v6  ;;  %v1176_v15 = vadd.f32 %v1143_v42, %v1142_v45  ;;  %v3341_v42 = vld [vmem:[#allocation27_spill] sm:$0xff] }
 0x37e   : > { %v1725_v60 = vpop.eup %1724  ;;  %v1038_v58 = vmul.f32 %v1723_v10, %v2444_v1  ;;  %v1166_v27 = vmul.f32 %v1723_v10, %v1723_v10  ;;  %v1169_v1 = vmul.f32 %v2765_v50, %v2765_v50 }
 0x37f   : > { %v906_v7 = vadd.f32 %v1725_v60, %v1723_v10  ;;  %v2818_v11 = vadd.f32 %v1163_v38, %v1162_v37  ;;  %v1039_v63 = vmul.f32 %v1725_v60, %v2447_v4  ;;  %v1167_v16 = vmul.f32 %v1725_v60, %v1725_v60  ;;  %v3342_v37 = vld [vmem:[#allocation28_spill] sm:$0xff] }
 0x380   : > { %910 = vadd.xlane.f32.xlu0 %v909_v19  ;;  %901 = vadd.xlane.f32.xlu1 %v900_v12  ;;  %v1161_v19 = vmul.f32 %v1703_v36, %v1703_v36  ;;  %v2808_v12 = vadd.f32 %v1033_v53, %v1032_v48  ;;  %v1165_v36 = vmul.f32 %v1709_v31, %v1709_v31 }
 0x381   : > { %v2829_v41 = vadd.f32 %v1039_v63, %v1038_v58  ;;  %v2831_v31 = vadd.f32 %v1167_v16, %v1166_v27  ;;  %v1051_v4 = vadd.f32 %v1017_v46, %v1016_v52  ;;  %v1144_v10 = vmul.f32 %v2695_v47, %v2695_v47  ;;  %v3340_v52 = vld [vmem:[#allocation26_spill] sm:$0xff]  ;;  %v3345_v16 = vld [vmem:[#allocation31_spill] sm:$0xff] }
 0x382   : > { %v2815_v54 = vadd.f32 %v1161_v19, %v1160_v25  ;;  %v2824_v56 = vadd.f32 %v1165_v36, %v1164_v55  ;;  %v1020_v47 = vmul.f32 %v2709_v2, %v3339_v22  ;;  %v1146_v46 = vmul.f32 %v2717_v28, %v2717_v28 }
 0x383   : > { %v1147_v48 = vmul.f32 %v2719_v49, %v2719_v49  ;;  %v1148_v53 = vmul.f32 %v2709_v2, %v2709_v2  ;;  %v1149_v25 = vmul.f32 %v2712_v5, %v2712_v5  ;;  %v1022_v19 = vmul.f32 %v2735_v18, %v3341_v42 }
 0x384   : > { %1046 = vadd.xlane.f32.xlu0 %v1045_v32  ;;  %907 = vadd.xlane.f32.xlu1 %v906_v7  ;;  %v1040_v7 = vmul.f32 %v1717_v40, %v2465_v17  ;;  %v3336_v32 = vld [vmem:[#allocation44_spill] sm:$0xff]  ;;  %v1145_v17 = vmul.f32 %v2698_v51, %v2698_v51  ;;  %v3337_v40 = vld [vmem:[#allocation23_spill] sm:$0xff]  ;;  %v1021_v51 = vmul.f32 %v2712_v5, %v3340_v52 }
 0x385   : > { %v1041_v33 = vmul.f32 %v2765_v50, %v3336_v32  ;;  %v1018_v23 = vmul.f32 %v2717_v28, %v3337_v40  ;;  %v1182_v45 = vadd.f32 %v1147_v48, %v1146_v46  ;;  %v1023_v38 = vmul.f32 %v2738_v14, %v3342_v37  ;;  %v3346_v32 = vld [vmem:[#allocation32_spill] sm:$0xff] }
 0x386   : > { %v1179_v50 = vadd.f32 %v1145_v17, %v1144_v10  ;;  %v1185_v28 = vadd.f32 %v1149_v25, %v1148_v53  ;;  %v1025_v2 = vmul.f32 %v2730_v34, %v3344_v61  ;;  %v1150_v5 = vmul.f32 %v2735_v18, %v2735_v18  ;;  %v3349_v40 = vld [vmem:[#allocation36_spill] sm:$0xff] }
 0x387   : > { %v2839_v60 = vadd.f32 %v1041_v33, %v1040_v7  ;;  %v1151_v55 = vmul.f32 %v2738_v14, %v2738_v14  ;;  %v1152_v36 = vmul.f32 %v2724_v20, %v2724_v20  ;;  %v1153_v58 = vmul.f32 %v2730_v34, %v2730_v34  ;;  %v3347_v14 = vld [vmem:[#allocation33_spill] sm:$0xff] }
 0x388   : > { %1049 = vadd.xlane.f32.xlu0 %v1048_v21  ;;  %1043 = vadd.xlane.f32.xlu1 %v1042_v13  ;;  %v1019_v21 = vmul.f32 %v2719_v49, %v3338_v24  ;;  %v2845_v13 = vadd.f32 %v1169_v1, %v1168_v57  ;;  %v3343_v49 = vld [vmem:[#allocation29_spill] sm:$0xff]  ;;  %v1026_v7 = vmul.f32 %v2747_v62, %v3345_v16  ;;  %v3353_v53 = vlaneseq }
 0x389   : > { %v1024_v29 = vmul.f32 %v2724_v20, %v3343_v49  ;;  %v1188_v27 = vadd.f32 %v1151_v55, %v1150_v5  ;;  %v1027_v33 = vmul.f32 %v2753_v44, %v3346_v32  ;;  %v1191_v18 = vadd.f32 %v1153_v58, %v1152_v36  ;;  %v3350_v24 = vld [vmem:[#allocation37_spill] sm:$0xff] }
 0x38a   : > { %v1054_v35 = vadd.f32 %v1019_v21, %v1018_v23  ;;  %v1028_v57 = vmul.f32 %v2741_v8, %v3347_v14  ;;  %v1154_v34 = vmul.f32 %v2747_v62, %v2747_v62  ;;  %v1155_v10 = vmul.f32 %v2753_v44, %v2753_v44 }
 0x38b   : > { %v1063_v63 = vadd.f32 %v1025_v2, %v1024_v29  ;;  %v1066_v1 = vadd.f32 %v1027_v33, %v1026_v7  ;;  %v1030_v23 = vmul.f32 %v2757_v9, %v3349_v40  ;;  %v1031_v8 = vmul.f32 %v2759_v39, %v3350_v24 }
 0x38c   : > { %1174 = vadd.xlane.f32.xlu0 %v1173_v26  ;;  %1171 = vadd.xlane.f32.xlu1 %v1170_v30  ;;  %v1057_v26 = vadd.f32 %v1021_v51, %v1020_v47  ;;  %v1060_v30 = vadd.f32 %v1023_v38, %v1022_v19  ;;  %v1159_v62 = vmul.f32 %v2759_v39, %v2759_v39  ;;  %v3352_v47 = vld [vmem:[#allocation40_spill] sm:$0xff]  ;;  %v2924_v25 = vshrl.u32 %v3353_v53, 7 }
 0x38d   : > { %v1072_v21 = vadd.f32 %v1031_v8, %v1030_v23  ;;  %v1985_v36 = vmov 0.0  }
 0x38e   : > { %v930_v37 = vadd.s32 8, %v2924_v25  ;;  %v931_v38 = vadd.s32 16, %v2924_v25  ;;  %v933_v49 = vadd.s32 32, %v2924_v25  ;;  %v934_v2 = vadd.s32 40, %v2924_v25 }
 0x38f   : > { %v935_v5 = vadd.s32 48, %v2924_v25  ;;  %v937_v14 = vadd.s32 64, %v2924_v25 }
 0x390   : > { %1052 = vadd.xlane.f32.xlu0 %v1051_v4  ;;  %1177 = vadd.xlane.f32.xlu1 %v1176_v15  ;;  %v3348_v4 = vld [vmem:[#allocation34_spill] sm:$0xff]  ;;  %v1194_v15 = vadd.f32 %v1155_v10, %v1154_v34 }
 0x391   : > { %v1029_v20 = vmul.f32 %v2745_v0, %v3348_v4  ;;  %v1158_v0 = vmul.f32 %v2757_v9, %v2757_v9  ;;  %v940_v4 = vadd.s32 88, %v2924_v25 }
 0x393   : > { %v1069_v17 = vadd.f32 %v1029_v20, %v1028_v57  ;;  %v1200_v44 = vadd.f32 %v1159_v62, %v1158_v0  ;;  %v938_v57 = vadd.s32 72, %v2924_v25  ;;  %v941_v20 = vadd.s32 96, %v2924_v25 }
 0x394   : > { %1180 = vadd.xlane.f32.xlu0 %v1179_v50  ;;  %1055 = vadd.xlane.f32.xlu1 %v1054_v35  ;;  %v3351_v50 = vld [vmem:[#allocation39_spill] sm:$0xff]  ;;  %v1035_v35 = vmul.f32 %v2767_v6, %v3352_v47 }
 0x395   : > { %v1034_v22 = vmul.f32 %v2761_v43, %v3351_v50 }
 0x397   : > { %v1078_v52 = vadd.f32 %v1035_v35, %v1034_v22 }
 0x398   : > { %1058 = vadd.xlane.f32.xlu0 %v1057_v26  ;;  %1183 = vadd.xlane.f32.xlu1 %v1182_v45  ;;  %v2928_v26 = vstv %s3354_s19 }
 0x399   : > { %v946_v19 = vadd.s32 %v2928_v26, %v2924_v25  ;;  %v948_v55 = vadd.s32 %v2928_v26, %v931_v38  ;;  %v951_v32 = vadd.s32 %v2928_v26, %v934_v2  ;;  %v952_v33 = vadd.s32 %v2928_v26, %v935_v5 }
 0x39a   : > { %v954_v40 = vadd.s32 %v2928_v26, %v937_v14  ;;  %v955_v23 = vadd.s32 %v2928_v26, %v938_v57 }
 0x39b   : > { %vm962_vm4 = vcmp.lt.s32.totalorder %v946_v19, 240  ;;  %vm964_vm6 = vcmp.lt.s32.totalorder %v948_v55, 240  ;;  %vm967_vm9 = vcmp.lt.s32.totalorder %v951_v32, 240  ;;  %vm968_vm10 = vcmp.lt.s32.totalorder %v952_v33, 240 }
 0x39c   : > { %1186 = vadd.xlane.f32.xlu0 %v1185_v28  ;;  %1061 = vadd.xlane.f32.xlu1 %v1060_v30  ;;  %v932_v28 = vadd.s32 24, %v2924_v25  ;;  %v947_v30 = vadd.s32 %v2928_v26, %v930_v37  ;;  %v2949_v58 = vsel %vm962_vm4, 1.0, %v1985_v36  ;;  %v2981_v0 = vsel %vm964_vm6, 1.0, %v1985_v36 }
 0x39d   : > { %vm970_vm12 = vcmp.lt.s32.totalorder %v954_v40, 240  ;;  %vm971_vm13 = vcmp.lt.s32.totalorder %v955_v23, 240  ;;  %vm1380_vm6 = vcmask (!%p1554_p3), 16400  }
 0x39e   : > { %vm963_vm5 = vcmp.lt.s32.totalorder %v947_v30, 240  ;;  %v3027_v19 = vsel %vm970_vm12, 1.0, %v1985_v36 }
 0x39f   : > { %v2975_v24 = vsel %vm963_vm5, 1.0, %v1985_v36 }
 0x3a0   : > { %1064 = vadd.xlane.f32.xlu0 %v1063_v63  ;;  %1189 = vadd.xlane.f32.xlu1 %v1188_v27  ;;  %v949_v63 = vadd.s32 %v2928_v26, %v932_v28  ;;  %v950_v27 = vadd.s32 %v2928_v26, %v933_v49 }
 0x3a2   : > { %vm965_vm7 = vcmp.lt.s32.totalorder %v949_v63, 240  ;;  %vm966_vm8 = vcmp.lt.s32.totalorder %v950_v27, 240  ;;  %v3356_v63 = vld [vmem:[#allocation38_spill] sm:$0xff] }
 0x3a3   : > { %v2985_v62 = vsel %vm965_vm7, 1.0, %v1985_v36  ;;  %v2990_v22 = vsel %vm966_vm8, 1.0, %v1985_v36  ;;  %vm1391_vm7 = vcmask (!%p1554_p3), 24600  }
 0x3a4   : > { %1192 = vadd.xlane.f32.xlu0 %v1191_v18  ;;  %1067 = vadd.xlane.f32.xlu1 %v1066_v1  ;;  %v936_v18 = vadd.s32 56, %v2924_v25  ;;  %v939_v1 = vadd.s32 80, %v2924_v25 }
 0x3a6   : > { %v956_v8 = vadd.s32 %v2928_v26, %v939_v1 }
 0x3a8   : > { %1070 = vadd.xlane.f32.xlu0 %v1069_v17  ;;  %1195 = vadd.xlane.f32.xlu1 %v1194_v15  ;;  %v942_v17 = vadd.s32 104, %v2924_v25  ;;  %v953_v15 = vadd.s32 %v2928_v26, %v936_v18  ;;  %vm972_vm14 = vcmp.lt.s32.totalorder %v956_v8, 240 }
 0x3a9   : > { %v3039_v38 = vsel %vm972_vm14, 1.0, %v1985_v36 }
 0x3aa   : > { %vm969_vm11 = vcmp.lt.s32.totalorder %v953_v15, 240 }
 0x3ac   : > { %1198 = vadd.xlane.f32.xlu0 %v2798_v59  ;;  %1073 = vadd.xlane.f32.xlu1 %v1072_v21  ;;  %v957_v21 = vadd.s32 %v2928_v26, %v940_v4 }
 0x3ae   : > { %vm973_vm15 = vcmp.lt.s32.totalorder %v957_v21, 240 }
 0x3af   : > { %v3043_v28 = vsel %vm973_vm15, 1.0, %v1985_v36 }
 0x3b0   : > { %1201 = vadd.xlane.f32.xlu0 %v1200_v44  ;;  %1076 = vadd.xlane.f32.xlu1 %v2808_v12  ;;  %v958_v44 = vadd.s32 %v2928_v26, %v941_v20 }
 0x3b2   : > { %vm974_vm0 = vcmp.lt.s32.totalorder %v958_v44, 240 }
 0x3b3   : > { %v3050_v5 = vsel %vm974_vm0, 1.0, %v1985_v36 }
 0x3b4   : > { %1204 = vadd.xlane.f32.xlu0 %v2815_v54  ;;  %1079 = vadd.xlane.f32.xlu1 %v1078_v52  ;;  %v2998_v52 = vsel %vm967_vm9, 1.0, %v1985_v36 }
 0x3b8   : > { %1207 = vadd.xlane.f32.xlu0 %v2818_v11  ;;  %1082 = vadd.xlane.f32.xlu1 %v2821_v3 }
 0x3bc   : > { %1210 = vadd.xlane.f32.xlu0 %v2824_v56  ;;  %1085 = vadd.xlane.f32.xlu1 %v2829_v41 }
 0x3c0   : > { %1213 = vadd.xlane.f32.xlu0 %v2831_v31  ;;  %1088 = vadd.xlane.f32.xlu1 %v2839_v60 }
 0x3c4   : > { %1216 = vadd.xlane.f32.xlu1 %v2845_v13 }
 0x3f1   : > { %v866_v9 = vpop.xlane.xlu0 %865 }
 0x3f2   : > { %1726 = vrcp.f32 %v866_v9  ;;  %v3002_v9 = vsel %vm968_vm10, 1.0, %v1985_v36 }
 0x3f5   : > { %v869_v39 = vpop.xlane.xlu1 %868  ;;  %v872_v43 = vpop.xlane.xlu0 %871 }
 0x3f6   : > { %1728 = vrcp.f32 %v869_v39  ;;  %v959_v39 = vadd.s32 %v2928_v26, %v942_v17 }
 0x3f7   : > { %1730 = vrcp.f32 %v872_v43 }
 0x3f8   : > { %vm975_vm2 = vcmp.lt.s32.totalorder %v959_v39, 240 }
 0x3f9   : > { %v875_v6 = vpop.xlane.xlu1 %874  ;;  %v878_v59 = vpop.xlane.xlu0 %877  ;;  %v3059_v33 = vsel %vm975_vm2, 1.0, %v1985_v36 }
 0x3fa   : > { %1732 = vrcp.f32 %v875_v6 }
 0x3fb   : > { %1734 = vrcp.f32 %v878_v59 }
 0x3fc   : > { %v1727_v50 = vpop.eup %1726 }
 0x3fd   : > { %v881_v12 = vpop.xlane.xlu1 %880  ;;  %v884_v54 = vpop.xlane.xlu0 %883  ;;  %v1218_v2 = vmul.f32 %v1727_v50, %v1727_v50 }
 0x3fe   : > { %1736 = vrcp.f32 %v881_v12  ;;  %v943_v12 = vadd.s32 112, %v2924_v25 }
 0x3ff   : > { %1738 = vrcp.f32 %v884_v54 }
 0x400   : > { %v1729_v43 = vpop.eup %1728 }
 0x401   : > { %v887_v11 = vpop.xlane.xlu1 %886  ;;  %v893_v3 = vpop.xlane.xlu0 %892  ;;  %v1219_v32 = vmul.f32 %v1729_v43, %v1729_v43 }
 0x402   : > { %1740 = vrcp.f32 %v887_v11  ;;  %v3006_v59 = vpop.eup %1730 }
 0x403   : > { %1742 = vrcp.f32 %v893_v3  ;;  %v944_v3 = vadd.s32 120, %v2924_v25  ;;  %v3355_v25 = vld [vmem:[#allocation35_spill] sm:$0xff]  ;;  %v1220_v57 = vmul.f32 %v3006_v59, %v3006_v59 }
 0x404   : > { %v3010_v54 = vpop.eup %1732 }
 0x405   : > { %v890_v51 = vpop.xlane.xlu1 %889  ;;  %v2909_v56 = vpop.xlane.xlu0 %898  ;;  %v3062_v18 = vadd.s32 %v2928_v26, %v944_v3  ;;  %v1221_v4 = vmul.f32 %v3010_v54, %v3010_v54 }
 0x406   : > { %1744 = vrcp.f32 %v890_v51  ;;  %v3015_v51 = vpop.eup %1734 }
 0x407   : > { %1746 = vrcp.f32 %v2909_v56  ;;  %v3023_v56 = vsel %vm969_vm11, 1.0, %v1985_v36  ;;  %v1222_v23 = vmul.f32 %v3015_v51, %v3015_v51  ;;  %vm977_vm5 = vcmp.lt.s32.totalorder %v3062_v18, 240 }
 0x409   : > { %v2911_v41 = vpop.xlane.xlu1 %895  ;;  %v2913_v31 = vpop.xlane.xlu0 %904 }
 0x40a   : > { %1748 = vrcp.f32 %v2911_v41  ;;  %v3031_v41 = vsel %vm971_vm13, 1.0, %v1985_v36 }
 0x40d   : > { %v2915_v60 = vpop.xlane.xlu1 %901  ;;  %v2917_v13 = vpop.xlane.xlu0 %910 }
 0x40e   : > { %1750 = vrcp.f32 %v2915_v60  ;;  %v3053_v60 = vadd.s32 %v2928_v26, %v943_v12 }
 0x40f   : > { %1752 = vrcp.f32 %v2913_v31 }
 0x410   : > { %1754 = vrcp.f32 %v2917_v13  ;;  %vm976_vm4 = vcmp.lt.s32.totalorder %v3053_v60, 240 }
 0x411   : > { %v2919_v46 = vpop.xlane.xlu1 %907  ;;  %v2921_v48 = vpop.xlane.xlu0 %1046 }
 0x412   : > { %v1091_v11 = vsub.f32 0.0, %v2921_v48  ;;  %v3033_v48 = vpop.eup %1736  ;;  %1756 = vrcp.f32 %v2919_v46 }
 0x413   : > { %v3045_v49 = vpop.eup %1738 }
 0x414   : > { %v3055_v55 = vpop.eup %1740  ;;  %v1107_v27 = vmul.f32 %v1091_v11, %v3356_v63  ;;  %v1224_v44 = vmul.f32 %v3045_v49, %v3045_v49 }
 0x415   : > { %v2930_v45 = vpop.xlane.xlu1 %1043  ;;  %v2932_v42 = vpop.xlane.xlu0 %1049 }
 0x416   : > { %v1090_v6 = vsub.f32 0.0, %v2930_v45  ;;  %v1092_v30 = vsub.f32 0.0, %v2932_v42  ;;  %v3064_v42 = vpop.eup %1742  ;;  %v1123_v39 = vmul.f32 %v1729_v43, %v1107_v27 }
 0x417   : > { %v3074_v15 = vpop.eup %1744 }
 0x418   : > { %v1106_v37 = vmul.f32 %v1090_v6, %v3355_v25  ;;  %v3091_v6 = vmul.f32 %v3064_v42, %v3064_v42  ;;  %v3093_v12 = vpop.eup %1746 }
 0x419   : > { %v2940_v29 = vpop.xlane.xlu1 %1171  ;;  %v2943_v61 = vpop.xlane.xlu0 %1174 }
 0x41a   : > { %v1234_v14 = vmul.f32 %v1218_v2, %v2940_v29  ;;  %v1122_v40 = vmul.f32 %v1727_v50, %v1106_v37  ;;  %v1235_v26 = vmul.f32 %v1219_v32, %v2943_v61  ;;  %v1223_v29 = vmul.f32 %v3033_v48, %v3033_v48  ;;  %v3100_v43 = vpop.eup %1748 }
 0x41b   : > { %v1225_v61 = vmul.f32 %v3055_v55, %v3055_v55 }
 0x41c   : > { %v1250_v31 = vmul.f32 %v2949_v58, %v1234_v14  ;;  %v1267_v37 = vsel %vm558_vm1, %v1122_v40, 0.0  ;;  %v3359_v58 = vld [vmem:[#allocation43_spill] sm:$0xff]  ;;  %v3110_v14 = vpop.eup %1750 }
 0x41d   : > { %v2953_v16 = vpop.xlane.xlu1 %1177  ;;  %v2955_v7 = vpop.xlane.xlu0 %1052 }
 0x41e   : > { %v1093_v1 = vsub.f32 0.0, %v2955_v7  ;;  %v3357_v7 = vld [vmem:[#allocation41_spill] sm:$0xff]  ;;  %v1236_v50 = vmul.f32 %v1220_v57, %v2953_v16  ;;  %v1226_v16 = vmul.f32 %v3074_v15, %v3074_v15  ;;  %v1268_v57 = vsel %vm558_vm1, %v1123_v39, 0.0 }
 0x41f   : > { %v1108_v8 = vmul.f32 %v1092_v30, %v3357_v7  ;;  %v1251_v30 = vmul.f32 %v2975_v24, %v1235_v26  ;;  %v1311_v46 = vsel %vm558_vm1, %v1250_v31, 0.0  ;;  %v3361_v31 = vld [vmem:[#allocation46_spill] sm:$0xff] }
 0x421   : > { %v2965_v34 = vpop.xlane.xlu1 %1055  ;;  %v2967_v10 = vpop.xlane.xlu0 %1180  ;;  %v1124_v13 = vmul.f32 %v3006_v59, %v1108_v8  ;;  %v1312_v26 = vsel %vm558_vm1, %v1251_v30, 0.0 }
 0x422   : > { %v1094_v21 = vsub.f32 0.0, %v2965_v34  ;;  %v3358_v34 = vld [vmem:[#allocation42_spill] sm:$0xff]  ;;  %v1237_v2 = vmul.f32 %v1221_v4, %v2967_v10  ;;  %v3117_v10 = vmul.f32 %v3093_v12, %v3093_v12  ;;  %v1313_v30 = vadd.f32 %v1312_v26, %v1311_v46 }
 0x423   : > { %v1109_v11 = vmul.f32 %v1093_v1, %v3358_v34  ;;  %v1252_v1 = vmul.f32 %v2981_v0, %v1236_v50  ;;  %v1270_v8 = vsel %vm558_vm1, %v1124_v13, 0.0 }
 0x424   : > { %v1110_v27 = vmul.f32 %v1094_v21, %v3359_v58  ;;  %v1253_v0 = vmul.f32 %v2985_v62, %v1237_v2 }
 0x425   : > { %v2992_v47 = vpop.xlane.xlu1 %1183  ;;  %v2994_v35 = vpop.xlane.xlu0 %1058  ;;  %v1125_v59 = vmul.f32 %v3010_v54, %v1109_v11  ;;  %v3132_v54 = vmul.f32 %v3110_v14, %v3110_v14  ;;  %v1314_v50 = vsel %vm558_vm1, %v1252_v1, 0.0 }
 0x426   : > { %v1095_v63 = vsub.f32 0.0, %v2994_v35  ;;  %v1238_v32 = vmul.f32 %v1222_v23, %v2992_v47  ;;  %v1269_v35 = vadd.f32 %v1268_v57, %v1267_v37  ;;  %v1228_v47 = vmul.f32 %v3100_v43, %v3100_v43  ;;  %v3360_v23 = vld [vmem:[#allocation45_spill] sm:$0xff]  ;;  %v3137_v37 = vpop.eup %1752 }
 0x427   : > { %v1126_v21 = vmul.f32 %v3015_v51, %v1110_v27  ;;  %v1272_v2 = vsel %vm558_vm1, %v1125_v59, 0.0  ;;  %v1316_v13 = vsel %vm558_vm1, %v1253_v0, 0.0  ;;  %v3362_v27 = vld [vmem:[#allocation47_spill] sm:$0xff]  ;;  %v3143_v1 = vpop.eup %1754 }
 0x428   : > { %v1254_v39 = vmul.f32 %v2990_v22, %v1238_v32  ;;  %v3150_v26 = vpop.eup %1756 }
 0x429   : > { %v3017_v53 = vpop.xlane.xlu1 %1061  ;;  %v3019_v45 = vpop.xlane.xlu0 %1186 }
 0x42a   : > { %v1096_v24 = vsub.f32 0.0, %v3017_v53  ;;  %v1111_v53 = vmul.f32 %v1095_v63, %v3360_v23  ;;  %v1239_v62 = vmul.f32 %v1223_v29, %v3019_v45  ;;  %v1315_v45 = vadd.f32 %v1314_v50, %v1313_v30 }
 0x42b   : > { %v1274_v29 = vsel %vm558_vm1, %v1126_v21, 0.0 }
 0x42c   : > { %v1112_v34 = vmul.f32 %v1096_v24, %v3361_v31  ;;  %v1127_v58 = vmul.f32 %v3033_v48, %v1111_v53  ;;  %v1317_v0 = vadd.f32 %v1316_v13, %v1315_v45 }
 0x42d   : > { %v1190_v20 = vpop.xlane.xlu1 %1189  ;;  %v3072_v17 = vpop.xlane.xlu0 %1064 }
 0x42e   : > { %v1097_v7 = vsub.f32 0.0, %v3072_v17  ;;  %v1271_v17 = vadd.f32 %v1270_v8, %v1269_v35  ;;  %v1240_v51 = vmul.f32 %v1224_v44, %v1190_v20  ;;  %v1128_v35 = vmul.f32 %v3045_v49, %v1112_v34  ;;  %v3363_v44 = vld [vmem:[#allocation48_spill] sm:$0xff] }
 0x42f   : > { %v1255_v20 = vmul.f32 %v2998_v52, %v1239_v62  ;;  %v1276_v8 = vsel %vm558_vm1, %v1127_v58, 0.0 }
 0x430   : > { %v1113_v32 = vmul.f32 %v1097_v7, %v3362_v27  ;;  %v1273_v48 = vadd.f32 %v1272_v2, %v1271_v17  ;;  %v1278_v34 = vsel %vm558_vm1, %v1128_v35, 0.0 }
 0x431   : > { %v1068_v3 = vpop.xlane.xlu1 %1067  ;;  %v1193_v25 = vpop.xlane.xlu0 %1192 }
 0x432   : > { %v1098_v11 = vsub.f32 0.0, %v1068_v3  ;;  %v1318_v3 = vsel %vm558_vm1, %v1254_v39, 0.0  ;;  %v1241_v24 = vmul.f32 %v1225_v61, %v1193_v25  ;;  %v1129_v61 = vmul.f32 %v3055_v55, %v1113_v32  ;;  %v3364_v25 = vld [vmem:[#allocation49_spill] sm:$0xff] }
 0x433   : > { %v1275_v52 = vadd.f32 %v1274_v29, %v1273_v48  ;;  %v1319_v39 = vadd.f32 %v1318_v3, %v1317_v0 }
 0x434   : > { %v1114_v46 = vmul.f32 %v1098_v11, %v3363_v44  ;;  %v1257_v50 = vmul.f32 %v3023_v56, %v1241_v24 }
 0x435   : > { %v1196_v4 = vpop.xlane.xlu1 %1195  ;;  %v1071_v40 = vpop.xlane.xlu0 %1070  ;;  %v1277_v55 = vadd.f32 %v1276_v8, %v1275_v52 }
 0x436   : > { %v1099_v57 = vsub.f32 0.0, %v1071_v40  ;;  %v1256_v40 = vmul.f32 %v3002_v9, %v1240_v51  ;;  %v1242_v23 = vmul.f32 %v1226_v16, %v1196_v4  ;;  %v1320_v9 = vsel %vm558_vm1, %v1255_v20, 0.0  ;;  %v3365_v4 = vld [vmem:[#allocation50_spill] sm:$0xff] }
 0x437   : > { %v1130_v16 = vmul.f32 %v3074_v15, %v1114_v46  ;;  %v1279_v15 = vadd.f32 %v1278_v34, %v1277_v55  ;;  %v1321_v58 = vadd.f32 %v1320_v9, %v1319_v39  ;;  %v1324_v27 = vsel %vm558_vm1, %v1257_v50, 0.0 }
 0x438   : > { %v1115_v49 = vmul.f32 %v1099_v57, %v3364_v25  ;;  %v1322_v11 = vsel %vm558_vm1, %v1256_v40, 0.0  ;;  %v1258_v17 = vmul.f32 %v3027_v19, %v1242_v23  ;;  %v1232_v9 = vmul.f32 %v3150_v26, %v3150_v26 }
 0x439   : > { %v1074_v63 = vpop.xlane.xlu1 %1073  ;;  %v1199_v22 = vpop.xlane.xlu0 %1198  ;;  %v1282_v57 = vsel %vm558_vm1, %v1130_v16, 0.0  ;;  %v1323_v3 = vadd.f32 %v1322_v11, %v1321_v58  ;;  %v3370_v58 = vld [vmem:[#allocation55_spill] sm:$0xff] }
 0x43a   : > { %v1100_v59 = vsub.f32 0.0, %v1074_v63  ;;  %v1243_v31 = vmul.f32 %v3091_v6, %v1199_v22  ;;  %v1280_v6 = vsel %vm558_vm1, %v1129_v61, 0.0  ;;  %v1131_v51 = vmul.f32 %v3064_v42, %v1115_v49  ;;  %v3366_v63 = vld [vmem:[#allocation51_spill] sm:$0xff] }
 0x43b   : > { %v1281_v24 = vadd.f32 %v1280_v6, %v1279_v15  ;;  %v1326_v42 = vsel %vm558_vm1, %v1258_v17, 0.0  ;;  %v1325_v0 = vadd.f32 %v1324_v27, %v1323_v3 }
 0x43c   : > { %v1116_v62 = vmul.f32 %v1100_v59, %v3365_v4  ;;  %v1259_v32 = vmul.f32 %v3031_v41, %v1243_v31  ;;  %v1284_v46 = vsel %vm558_vm1, %v1131_v51, 0.0  ;;  %v3369_v4 = vld [vmem:[#allocation54_spill] sm:$0xff] }
 0x43d   : > { %v1077_v53 = vpop.xlane.xlu1 %1076  ;;  %v1202_v7 = vpop.xlane.xlu0 %1201  ;;  %v1327_v61 = vadd.f32 %v1326_v42, %v1325_v0 }
 0x43e   : > { %v1101_v21 = vsub.f32 0.0, %v1077_v53  ;;  %v1244_v30 = vmul.f32 %v1228_v47, %v1202_v7  ;;  %v1132_v19 = vmul.f32 %v3100_v43, %v1116_v62  ;;  %v3367_v47 = vld [vmem:[#allocation52_spill] sm:$0xff]  ;;  %v1283_v43 = vadd.f32 %v1282_v57, %v1281_v24  ;;  %v3368_v7 = vld [vmem:[#allocation53_spill] sm:$0xff] }
 0x43f   : > { %v1328_v40 = vsel %vm558_vm1, %v1259_v32, 0.0 }
 0x440   : > { %v1117_v22 = vmul.f32 %v1101_v21, %v3366_v63  ;;  %v1260_v35 = vmul.f32 %v3039_v38, %v1244_v30  ;;  %v1286_v23 = vsel %vm558_vm1, %v1132_v19, 0.0  ;;  %v1553_v19 = vsel %vm977_vm5, 1.0, %v1985_v36 }
 0x441   : > { %v1080_v2 = vpop.xlane.xlu1 %1079  ;;  %v1205_v56 = vpop.xlane.xlu0 %1204 }
 0x442   : > { %v1102_v13 = vsub.f32 0.0, %v1080_v2  ;;  %v1245_v29 = vmul.f32 %v3117_v10, %v1205_v56  ;;  %v1133_v41 = vmul.f32 %v3093_v12, %v1117_v22  ;;  %v1231_v10 = vmul.f32 %v3137_v37, %v3137_v37 }
 0x443   : > { %v1285_v12 = vadd.f32 %v1284_v46, %v1283_v43  ;;  %v1330_v25 = vsel %vm558_vm1, %v1260_v35, 0.0 }
 0x444   : > { %v1118_v45 = vmul.f32 %v1102_v13, %v3367_v47  ;;  %v1261_v53 = vmul.f32 %v3043_v28, %v1245_v29  ;;  %v1288_v52 = vsel %vm558_vm1, %v1133_v41, 0.0  ;;  %v1552_v28 = vsel %vm976_vm4, 1.0, %v1985_v36 }
 0x445   : > { %v1083_v20 = vpop.xlane.xlu1 %1082  ;;  %v1208_v44 = vpop.xlane.xlu0 %1207  ;;  %v1287_v34 = vadd.f32 %v1286_v23, %v1285_v12  ;;  %v1233_v13 = vmul.f32 %v3143_v1, %v3143_v1  ;;  %v1266_v12 = vld [vmem:[#allocation4] sm:$0x1] }
 0x446   : > { %v1103_v59 = vsub.f32 0.0, %v1083_v20  ;;  %v1246_v48 = vmul.f32 %v3132_v54, %v1208_v44  ;;  %v1134_v38 = vmul.f32 %v3110_v14, %v1118_v45  ;;  %v1329_v14 = vadd.f32 %v1328_v40, %v1327_v61 }
 0x448   : > { %v1119_v8 = vmul.f32 %v1103_v59, %v3368_v7  ;;  %v1262_v54 = vmul.f32 %v3050_v5, %v1246_v48  ;;  %v1290_v16 = vsel %vm558_vm1, %v1134_v38, 0.0  ;;  %v1332_v5 = vsel %vm558_vm1, %v1261_v53, 0.0 }
 0x449   : > { %v1086_v49 = vpop.xlane.xlu1 %1085  ;;  %v1211_v21 = vpop.xlane.xlu0 %1210  ;;  %v1331_v11 = vadd.f32 %v1330_v25, %v1329_v14 }
 0x44a   : > { %v1135_v39 = vmul.f32 %v3137_v37, %v1119_v8  ;;  %v1104_v50 = vsub.f32 0.0, %v1086_v49  ;;  %v1247_v31 = vmul.f32 %v1231_v10, %v1211_v21  ;;  %v1289_v37 = vadd.f32 %v1288_v52, %v1287_v34  ;;  %v1556_v34 = vld [vmem:[#allocation6] ss:$0 sm:$0xff] (!%p1554_p3) }
 0x44b   : > { %v1334_v17 = vsel %vm558_vm1, %v1262_v54, 0.0  ;;  %v1333_v22 = vadd.f32 %v1332_v5, %v1331_v11  ;;  %v1310_v54 = vld [vmem:[#allocation7] sm:$0x1] }
 0x44c   : > { %v1120_v62 = vmul.f32 %v1104_v50, %v3369_v4  ;;  %v1263_v55 = vmul.f32 %v3059_v33, %v1247_v31  ;;  %v1292_v60 = vsel %vm558_vm1, %v1135_v39, 0.0  ;;  %v1291_v63 = vadd.f32 %v1290_v16, %v1289_v37  ;;  %v1555_v39 = vld [vmem:[#allocation5] ss:$0 sm:$0xff] (!%p1554_p3) }
 0x44d   : > { %v1089_v30 = vpop.xlane.xlu1 %1088  ;;  %v1214_v2 = vpop.xlane.xlu0 %1213  ;;  %v1335_v18 = vadd.f32 %v1334_v17, %v1333_v22 }
 0x44e   : > { %v1136_v56 = vmul.f32 %v3150_v26, %v1120_v62  ;;  %v1105_v6 = vsub.f32 0.0, %v1089_v30  ;;  %v1248_v51 = vmul.f32 %v1232_v9, %v1214_v2  ;;  %v1336_v15 = vsel %vm558_vm1, %v1263_v55, 0.0 }
 0x44f   : > { %v1293_v57 = vadd.f32 %v1292_v60, %v1291_v63  ;;  %v1337_v3 = vadd.f32 %v1336_v15, %v1335_v18 }
 0x450   : > { %v1294_v33 = vsel %vm558_vm1, %v1136_v56, 0.0  ;;  %v1121_v27 = vmul.f32 %v1105_v6, %v3370_v58  ;;  %v1264_v32 = vmul.f32 %v1552_v28, %v1248_v51 }
 0x451   : > { %v1217_v47 = vpop.xlane.xlu1 %1216  ;;  %v1295_v24 = vadd.f32 %v1294_v33, %v1293_v57 }
 0x452   : > { %v1338_v26 = vsel %vm558_vm1, %v1264_v32, 0.0  ;;  %v1249_v45 = vmul.f32 %v1233_v13, %v1217_v47  ;;  %v1137_v29 = vmul.f32 %v3143_v1, %v1121_v27 }
 0x453   : > { %v1339_v44 = vadd.f32 %v1338_v26, %v1337_v3 }
 0x454   : > { %v1265_v42 = vmul.f32 %v1553_v19, %v1249_v45  ;;  %v1296_v35 = vsel %vm558_vm1, %v1137_v29, 0.0 }
 0x455   : > { %v1297_v20 = vadd.f32 %v1296_v35, %v1295_v24 }
 0x456   : > { %v1340_v46 = vsel %vm558_vm1, %v1265_v42, 0.0  ;;  %vm1369_vm1 = vcmask (!%p1554_p3), 8200  }
 0x457   : > { %1298 = vadd.xlane.f32.xlu0 %v1297_v20  ;;  %v1341_v41 = vadd.f32 %v1340_v46, %v1339_v44 }
 0x459   : > { %1342 = vadd.xlane.f32.xlu1 %v1341_v41 }
 0x46d   : > { %1366 = vrot.lane.b32.xlu0 (!%p1554_p3), %v1555_v39, %s1986_s24 }
 0x471   : > { %1377 = vrot.lane.b32.xlu0 (!%p1554_p3), %v1556_v34, %s1988_s26 }
 0x4e4   : > { %v1299_v59 = vpop.xlane.xlu0 %1298 }
 0x4e5   : > { %v1300_v36 = vrot.slane %v1299_v59, 4 }
 0x4e6   : > { %v1343_v48 = vpop.xlane.xlu1 %1342 }
 0x4e7   : > { %v1301_v43 = vadd.f32 %v1300_v36, %v1299_v59  ;;  %v1344_v0 = vrot.slane %v1343_v48, 4 }
 0x4e8   : > { %v1367_v14 = vpop.permute.xlu0 (!%p1554_p3), %1366 }
 0x4e9   : > { %v1302_v40 = vrot.slane %v1301_v43, 2  ;;  %v1345_v10 = vadd.f32 %v1344_v0, %v1343_v48 }
 0x4eb   : > { %v1346_v1 = vrot.slane %v1345_v10, 2  ;;  %v1303_v23 = vadd.f32 %v1302_v40, %v1301_v43 }
 0x4ec   : > { %v1378_v9 = vpop.permute.xlu0 (!%p1554_p3), %1377 }
 0x4ed   : > { %v1347_v38 = vadd.f32 %v1346_v1, %v1345_v10  ;;  %v1304_v53 = vrot.slane %v1303_v23, 1 }
 0x4ef   : > { %v1305_v7 = vadd.f32 %v1304_v53, %v1303_v23  ;;  %v1348_v8 = vrot.slane %v1347_v38, 1 }
 0x4f1   : > { %1571 = vpush %v1305_v7  ;;  %v1349_v61 = vadd.f32 %v1348_v8, %v1347_v38 }
 0x4f3   : > { %1573 = vpush %v1349_v61 }
 0x522   : > { %s1572_s20 = spop %1571  ;;  %1357 = sbr.rel (%p1554_p3) target bundleno = 1444 (0x5a4), region = 66 }
 0x523   : > { %v1307_v25 = vstv %s1572_s20 }
 0x524   : > { %v1308_v49 = vadd.f32 %v1307_v25, %v1266_v12  ;;  %s1574_s16 = spop %1573 }
 0x525   : > { %v1351_v21 = vstv %s1574_s16 }
 0x526   : > { %1309 = vst.msk [vmem:[#allocation4] sm:$0x1] %vm601_vm3, %v1308_v49  ;;  %v1352_v52 = vadd.f32 %v1351_v21, %v1310_v54 }
 0x528   : > { %1353 = vst.msk [vmem:[#allocation7] sm:$0x1] %vm601_vm3, %v1352_v52 }
 0x52d   : > { %v1358_v31 = vld [vmem:[#allocation4] sm:$0x1] }
 0x52e   : > { %1359 = vst.msk [vmem:[#allocation16] sm:$0x1] %vm601_vm3, %v1358_v31 }
 0x52f   : > { %v1557_v50 = vld [vmem:[#allocation7] ss:$0 sm:$0xff]  ;;  %1370 = vst.msk [vmem:[#allocation16] sm:$0x1] %vm1369_vm1, %v1367_v14 }
 0x530   : > { %1388 = vrot.lane.b32.xlu1 %v1557_v50, %s1987_s17  ;;  %1381 = vst.msk [vmem:[#allocation16] sm:$0x1] %vm1380_vm6, %v1378_v9 }
 0x5a2   : > { %v1389_v28 = vpop.permute.xlu1 %1388 }
 0x5a3   : > { %1392 = vst.msk [vmem:[#allocation16] sm:$0x1] %vm1391_vm7, %v1389_v28 }
 0x5a4 PF: > { %p1596_p1 = scmp.eq.s32.totalorder %s2051_s0, 1  ;;  %s1989_s13 = smov [#allocation16]  }
 0x5a5   : > { %s1400_s6 = sshll.u32 %s1989_s13, 4  ;;  %s1401_s6 = int_to_ptr.vmem [resolvable:$true] %s1400_s6 }
 0x5a6   : > { %s1882_s22 = scalar_lea.vmem %s1401_s6, 16  ;;  %s1888_s11 = scalar_lea.vmem %s1401_s6, 32 }
 0x5a7   : > { %p1883_p10 = scmp.ne.s32.totalorder %s1401_s6, %s1882_s22  ;;  %p1889_p8 = scmp.lt.s32.totalorder %s1401_s6, %s1401_s6 }
 0x5a8   : > { %p1890_p9 = scmp.lt.s32.totalorder %s1888_s11, %s1882_s22 }
 0x5a9   : > { %p1884_p5 = pnand %p1883_p10, %p1596_p1 }
 0x5aa   : > { %p1891_p4 = por %p1890_p9, %p1889_p8 }
 0x5ab   : > { %p1885_p6 = pneg %p1884_p5 }
 0x5ad   : > { %p1892_p7 = pnand %p1891_p4, %p1885_p6 }
 0x5af   : > { %1895 = shalt.err (!%p1892_p7)
}
 0x5b0   : > { %s1896_s25 = scalar_lea.hbm %s3258_s5, 16 }
 0x5b1   : > { %p1897_p0 = scmp.ne.s32.totalorder %s3258_s5, %s1896_s25  ;;  %p1902_p12 = scmp.lt.u32.totalorder %s1896_s25, %s3258_s5 }
 0x5b3   : > { %p1898_p2 = pnand %p1897_p0, %p1596_p1 }
 0x5b5   : > { %p1899_p13 = pneg %p1898_p2 }
 0x5b7   : > { %p1904_p11 = pnand %p1902_p12, %p1899_p13 }
 0x5b9   : > { %1907 = shalt.err (!%p1904_p11)
}
 0x5ba   : > { %1582 = dma.vmem_to_hbm [thread:$0]  (%p1596_p1), %s1401_s6, 16, %s3258_s5, [#allocation12]  }
 0x5bb   : > { %1945 = dma.done.wait (%p1596_p1), [#allocation12], 16  }
 0x5bc   : > { %1947 = vsyncadd (%p1596_p1), [#allocation12], 4294967280 }
 0x5bd PF: > { %p23_p3 = scmp.ge.s32.totalorder %s2054_s7, 4   ;;  %s3371_s28 = smov %s1954_s29 }
 0x5be   : > { %s3372_s29 = smov %s1958_s30  ;;  %s3373_s30 = smov %s2064_s10 }
 0x5bf   : > { %s3374_s6 = smov %s2054_s7  ;;  %25 = sbr.rel (!%p23_p3) target bundleno = 18 (0x12), region = 139 }
 0x5c6   :  { %1413 = vsyncpa [#allocation11], 1 }
 0x5c7   :  { %1415 = vsyncpa [#allocation11 + $0x1], 1 }
 0x5c8   :  { %1416 = vsyncpa [#allocation14], 1 }
 0x5c9   :  { %1418 = vsyncpa [#allocation14 + $0x1], 1 }
 0x5ca   :  { %1419 = vsyncpa [#allocation12], 1 }
 0x5cb   :  { %1421 = vsyncpa [#allocation12 + $0x1], 1 }
 0x5cc   :  { %1422 = vsyncmov [#allocation3] }
 0x5cf   :  { %s1423_s0 = vpop.sfrf %1422 }
 0x5d0   :  { %p1562_p1 = scmp.ne.s32.totalorder %s1423_s0, 0 }
 0x5d2   :  { %1427 = shalt.err (%p1562_p1)  }

</bundles_post_ra>
